<compile_context>
chip_gen: v6e
topology: v6e:2x2x1
jax: 0.10.0
libtpu: 0.0.40
codegen_flags: <defaults>
</compile_context>

<pallas_src>
import jax
import jax.numpy as jnp
from jax import lax
from jax.experimental import pallas as pl
from jax.experimental.pallas import tpu as pltpu


# ----------------------------------------------------------------------------
# Kernel 1: fused conv (matmul over pre-gathered, batch-grouped patch columns)
#           + bias + ReLU + 2x2/2 max-pool.  One grid step per image group.
# ----------------------------------------------------------------------------
def _conv_relu_pool_kernel(colsT_ref, w_ref, b_ref, o_ref):
    # colsT_ref: (4, K, N) bf16 — four pool-window corners; N = bt * OH2*OW2
    #            (bt images folded onto the lane axis -> lane-dense MXU/stores)
    # w_ref:     (OC, K)  bf16 — torch conv weight reshaped (OC, IC*KH*KW)
    # b_ref:     (OC, 1)  f32
    # o_ref:     (OC, N)  f32 — pooled activation
    w = w_ref[...]
    s00 = jnp.dot(w, colsT_ref[0], preferred_element_type=jnp.float32)
    s01 = jnp.dot(w, colsT_ref[1], preferred_element_type=jnp.float32)
    s10 = jnp.dot(w, colsT_ref[2], preferred_element_type=jnp.float32)
    s11 = jnp.dot(w, colsT_ref[3], preferred_element_type=jnp.float32)
    m = jnp.maximum(jnp.maximum(s00, s01), jnp.maximum(s10, s11))
    # relu(max_corners(conv) + b) == maxpool(relu(conv + b))  (monotone ops)
    o_ref[...] = jnp.maximum(m + b_ref[...], 0.0)


def conv_relu_pool(cols, w_mat, bias):
    nb, _, k, n = cols.shape
    oc = w_mat.shape[0]
    cost = pl.CostEstimate(
        flops=2 * 4 * nb * oc * k * n,
        transcendentals=0,
        bytes_accessed=(cols.size * cols.dtype.itemsize
                        + w_mat.size * w_mat.dtype.itemsize
                        + bias.size * 4 + nb * oc * n * 4),
    )
    return pl.pallas_call(
        _conv_relu_pool_kernel,
        out_shape=jax.ShapeDtypeStruct((nb, oc, n), jnp.float32),
        grid=(nb,),
        in_specs=[
            pl.BlockSpec((None, 4, k, n), lambda i: (i, 0, 0, 0)),
            pl.BlockSpec((oc, k), lambda i: (0, 0)),
            pl.BlockSpec((oc, 1), lambda i: (0, 0)),
        ],
        out_specs=pl.BlockSpec((None, oc, n), lambda i: (i, 0, 0)),
        compiler_params=pltpu.CompilerParams(
            dimension_semantics=("parallel",),
            vmem_limit_bytes=32 * 1024 * 1024,
        ),
        cost_estimate=cost,
    )(cols, w_mat, bias)


# ----------------------------------------------------------------------------
# Kernel 2: fused FC stack (fc1+ReLU -> fc2+ReLU -> fc3); intermediates stay
# on-chip.  Hidden dims are pre-padded to 128 so chained dots are lane-full.
# ----------------------------------------------------------------------------
def _fc_stack_kernel(x_ref, w1_ref, b1_ref, w2_ref, b2_ref, w3_ref, b3_ref,
                     o_ref):
    h = jnp.dot(x_ref[...], w1_ref[...],
                preferred_element_type=jnp.float32) + b1_ref[...]
    h = jnp.maximum(h, 0.0)
    h = jnp.dot(h, w2_ref[...],
                preferred_element_type=jnp.float32) + b2_ref[...]
    h = jnp.maximum(h, 0.0)
    o_ref[...] = jnp.dot(h, w3_ref[...],
                         preferred_element_type=jnp.float32) + b3_ref[...]


def fc_stack(x, w1, b1, w2, b2, w3, b3, *, block_m=512):
    m, k1 = x.shape
    n1, n2, n3 = w1.shape[1], w2.shape[1], w3.shape[1]
    # Full-batch block when small (always layout-legal); multiple-of-8 blocks
    # of 512 rows for large batches (weights are resident, so bigger tm only
    # costs ~tm*400*4 B of activations while amortizing per-step overhead).
    tm = m if m <= block_m else block_m
    full = lambda i: (0, 0)
    return pl.pallas_call(
        _fc_stack_kernel,
        out_shape=jax.ShapeDtypeStruct((m, n3), jnp.float32),
        grid=(pl.cdiv(m, tm),),
        in_specs=[
            pl.BlockSpec((tm, k1), lambda i: (i, 0)),
            pl.BlockSpec((k1, n1), full), pl.BlockSpec((1, n1), full),
            pl.BlockSpec((n1, n2), full), pl.BlockSpec((1, n2), full),
            pl.BlockSpec((n2, n3), full), pl.BlockSpec((1, n3), full),
        ],
        out_specs=pl.BlockSpec((tm, n3), lambda i: (i, 0)),
        compiler_params=pltpu.CompilerParams(
            dimension_semantics=("parallel",),
            vmem_limit_bytes=32 * 1024 * 1024,
        ),
    )(x, w1, b1, w2, b2, w3, b3)


# ----------------------------------------------------------------------------
# Plain-JAX glue: transposed, pool-window-grouped, batch-grouped im2col.
# Returns (B/bt, 4, IC*kh*kw, bt*OH2*OW2) in bf16.  Corner index = 2*dy+dx,
# K index = ic*kh*kw + i*kw + j (matches conv_w.reshape(OC, -1)),
# last-axis index = b_local*S + (y*OW2 + x).
# ----------------------------------------------------------------------------
def _pooled_patches_grouped(x_nchw, kh, kw, bt, dtype=jnp.bfloat16):
    b, c, h, w = x_nchw.shape
    oh, ow = h - kh + 1, w - kw + 1
    oh2, ow2 = oh // 2, ow // 2
    s = oh2 * ow2
    k = c * kh * kw
    nb = b // bt
    corners = []
    for dy in (0, 1):
        for dx in (0, 1):
            taps = []
            for i in range(kh):
                for j in range(kw):
                    p = x_nchw[:, :,
                               dy + i: dy + i + 2 * oh2: 2,
                               dx + j: dx + j + 2 * ow2: 2]    # (B,C,OH2,OW2)
                    taps.append(p.reshape(b, c, s))
            t = jnp.stack(taps, axis=2).reshape(b, k, s)        # (B,K,S)
            t = t.reshape(nb, bt, k, s).transpose(0, 2, 1, 3)   # (nb,K,bt,S)
            corners.append(t.reshape(nb, k, bt * s))
    return jnp.stack(corners, axis=1).astype(dtype)             # (nb,4,K,bt*S)


def _pick_bt(b, bt_target):
    """Images per conv grid step."""
    if b >= 2 * bt_target:
        return bt_target                 # lane width bt_target*S (mult of 128)
    return max(1, -(-b // 2))            # >=2 grid steps (both TCs on v7x)


def _stage_conv(x_nchw, w_mat, bias, kh, kw, bt_target):
    b, c, h, w = x_nchw.shape
    oc = w_mat.shape[0]
    oh2, ow2 = (h - kh + 1) // 2, (w - kw + 1) // 2
    bt = _pick_bt(b, bt_target)
    bp = -(-b // bt) * bt
    if bp != b:                                            # pad batch to bt
        x_nchw = jnp.concatenate(
            [x_nchw, jnp.zeros((bp - b, c, h, w), x_nchw.dtype)], axis=0)
    cols = _pooled_patches_grouped(x_nchw, kh, kw, bt)     # (nb,4,K,bt*S) bf16
    out = conv_relu_pool(cols, w_mat, bias)                # (nb,OC,bt*S) f32
    nb = bp // bt
    out = out.reshape(nb, oc, bt, oh2, ow2).transpose(0, 2, 1, 3, 4)
    return out.reshape(bp, oc, oh2, ow2)[:b]               # NCHW, padding dropped


# ----------------------------------------------------------------------------
# Params
# ----------------------------------------------------------------------------
def init_params(key):
    ks = jax.random.split(key, 10)
    s = 0.1
    return {  # PyTorch-shaped parameters
        "conv1_w": jax.random.normal(ks[0], (6, 3, 5, 5), jnp.float32) * s,
        "conv1_b": jax.random.normal(ks[1], (6,), jnp.float32) * s,
        "conv2_w": jax.random.normal(ks[2], (16, 6, 5, 5), jnp.float32) * s,
        "conv2_b": jax.random.normal(ks[3], (16,), jnp.float32) * s,
        "fc1_w": jax.random.normal(ks[4], (120, 400), jnp.float32) * s,
        "fc1_b": jax.random.normal(ks[5], (120,), jnp.float32) * s,
        "fc2_w": jax.random.normal(ks[6], (84, 120), jnp.float32) * s,
        "fc2_b": jax.random.normal(ks[7], (84,), jnp.float32) * s,
        "fc3_w": jax.random.normal(ks[8], (10, 84), jnp.float32) * s,
        "fc3_b": jax.random.normal(ks[9], (10,), jnp.float32) * s,
    }


def prepare_params(p):
    """One-time re-layout into kernel-friendly form (no per-step layout ops)."""
    def pad2(a, rows, cols_):
        return jnp.pad(a, ((0, rows - a.shape[0]), (0, cols_ - a.shape[1])))
    return {
        # conv weights: (OC, IC*KH*KW), bf16 (native MXU path, half the DMA)
        "conv1_w": p["conv1_w"].reshape(6, 75).astype(jnp.bfloat16),
        "conv1_b": p["conv1_b"].reshape(6, 1).astype(jnp.float32),
        "conv2_w": p["conv2_w"].reshape(16, 150).astype(jnp.bfloat16),
        "conv2_b": p["conv2_b"].reshape(16, 1).astype(jnp.float32),
        # FC weights pre-transposed; hidden dims zero-padded 120->128, 84->128.
        # Padded columns stay 0 through +bias/ReLU and the matching extra rows
        # of the next weight are 0, so results are bit-identical in intent.
        "fc1_w": pad2(p["fc1_w"].T, 400, 128),
        "fc1_b": pad2(p["fc1_b"].reshape(1, -1), 1, 128),
        "fc2_w": pad2(p["fc2_w"].T, 128, 128),
        "fc2_b": pad2(p["fc2_b"].reshape(1, -1), 1, 128),
        "fc3_w": pad2(p["fc3_w"].T, 128, 10),
        "fc3_b": p["fc3_b"].reshape(1, 10),
    }


# ----------------------------------------------------------------------------
# Full Net forward (NCHW input, exactly like the PyTorch module)
# ----------------------------------------------------------------------------
def net_forward(prepared, x_nchw):
    x = x_nchw.astype(jnp.float32)
    b = x.shape[0]
    # conv1 + ReLU + pool (fused)  -> (B, 6, 14, 14)
    h1 = _stage_conv(x, prepared["conv1_w"], prepared["conv1_b"], 5, 5, 32)
    # conv2 + ReLU + pool (fused)  -> (B, 16, 5, 5)
    h2 = _stage_conv(h1, prepared["conv2_w"], prepared["conv2_b"], 5, 5, 128)
    # NCHW flatten order == PyTorch .view(-1, 400)
    flat = h2.reshape(b, -1)
    # fused FC stack
    return fc_stack(flat,
                    prepared["fc1_w"], prepared["fc1_b"],
                    prepared["fc2_w"], prepared["fc2_b"],
                    prepared["fc3_w"], prepared["fc3_b"])


# ----------------------------------------------------------------------------
# Pure-JAX f32 reference (mirrors the PyTorch module) for a correctness check.
# ----------------------------------------------------------------------------
def net_reference(p, x):
    x = x.astype(jnp.float32)

    def conv(x, w, b):
        y = lax.conv_general_dilated(x, w, (1, 1), "VALID",
                                     dimension_numbers=("NCHW", "OIHW", "NCHW"))
        return y + b.reshape(1, -1, 1, 1)

    def pool(x):
        return lax.reduce_window(x, -jnp.inf, lax.max,
                                 (1, 1, 2, 2), (1, 1, 2, 2), "VALID")

    x = pool(jnp.maximum(conv(x, p["conv1_w"], p["conv1_b"]), 0.0))
    x = pool(jnp.maximum(conv(x, p["conv2_w"], p["conv2_b"]), 0.0))
    x = x.reshape(x.shape[0], -1)
    x = jnp.maximum(x @ p["fc1_w"].T + p["fc1_b"], 0.0)
    x = jnp.maximum(x @ p["fc2_w"].T + p["fc2_b"], 0.0)
    return x @ p["fc3_w"].T + p["fc3_b"]


if __name__ == "__main__":
    key = jax.random.PRNGKey(0)
    pkey, xkey = jax.random.split(key)
    params = init_params(pkey)
    prepared = prepare_params(params)          # one-time weight re-layout
    # fc1 expects 16*5*5 = 400 features -> input must be (B, 3, 32, 32).
    # Batch 8 keeps shapes small while giving the conv kernels 2 grid steps.
    x = jax.random.normal(xkey, (8, 3, 32, 32), jnp.float32)

    out = jax.block_until_ready(jax.jit(net_forward)(prepared, x))
    assert out.shape == (8, 10), out.shape
    assert bool(jnp.all(jnp.isfinite(out)))

    ref = net_reference(params, x)
    # bf16 conv inputs/weights (per perf review) -> modest tolerance vs f32 ref
    assert bool(jnp.allclose(out, ref, rtol=5e-2, atol=5e-2)), (
        float(jnp.max(jnp.abs(out - ref))))
    print("KERNEL_OK")
</pallas_src>

<mosaic_0001>
module attributes {stable_mosaic.version = 11 : i64} {
  func.func @_conv_relu_pool_kernel(%arg0: i32, %arg1: memref<1x4x75x784xbf16, #tpu.memory_space<vmem>>, %arg2: memref<6x75xbf16, #tpu.memory_space<vmem>>, %arg3: memref<6x1xf32, #tpu.memory_space<vmem>>, %arg4: memref<1x6x784xf32, #tpu.memory_space<vmem>>) attributes {dimension_semantics = [#tpu.dimension_semantics<parallel>], iteration_bounds = array<i64: 2>, scalar_prefetch = 0 : i64, scratch_operands = 0 : i64, tpu.core_type = #tpu.core_type<tc>, window_params = [{transform_indices = @transform_0, window_bounds = array<i64: 1, 4, 75, 784>}, {pipeline_mode = #tpu.pipeline_mode<synchronous>, transform_indices = @transform_1, window_bounds = array<i64: 6, 75>}, {pipeline_mode = #tpu.pipeline_mode<synchronous>, transform_indices = @transform_2, window_bounds = array<i64: 6, 1>}, {transform_indices = @transform_3, window_bounds = array<i64: 1, 6, 784>}]} {
    %c0 = arith.constant 0 : index
    %c0_0 = arith.constant 0 : index
    %0 = vector.load %arg2[%c0, %c0_0] : memref<6x75xbf16, #tpu.memory_space<vmem>>, vector<6x75xbf16>
    %c0_1 = arith.constant 0 : index
    %c0_2 = arith.constant 0 : index
    %c0_3 = arith.constant 0 : index
    %c0_4 = arith.constant 0 : index
    %1 = vector.load %arg1[%c0_1, %c0_2, %c0_3, %c0_4] : memref<1x4x75x784xbf16, #tpu.memory_space<vmem>>, vector<1x1x75x784xbf16>
    %2 = vector.shape_cast %1 : vector<1x1x75x784xbf16> to vector<75x784xbf16>
    %cst = arith.constant dense<0.000000e+00> : vector<6x784xf32>
    %3 = tpu.matmul %0, %2, %cst {dimension_numbers = #tpu.dot_dimension_numbers<[1], [0], [0], [1], [0, 0, 1, 1], [], []>} : vector<6x75xbf16>, vector<75x784xbf16>, vector<6x784xf32> -> vector<6x784xf32>
    %c0_5 = arith.constant 0 : index
    %c1 = arith.constant 1 : index
    %c0_6 = arith.constant 0 : index
    %c0_7 = arith.constant 0 : index
    %4 = vector.load %arg1[%c0_5, %c1, %c0_6, %c0_7] : memref<1x4x75x784xbf16, #tpu.memory_space<vmem>>, vector<1x1x75x784xbf16>
    %5 = vector.shape_cast %4 : vector<1x1x75x784xbf16> to vector<75x784xbf16>
    %cst_8 = arith.constant dense<0.000000e+00> : vector<6x784xf32>
    %6 = tpu.matmul %0, %5, %cst_8 {dimension_numbers = #tpu.dot_dimension_numbers<[1], [0], [0], [1], [0, 0, 1, 1], [], []>} : vector<6x75xbf16>, vector<75x784xbf16>, vector<6x784xf32> -> vector<6x784xf32>
    %c0_9 = arith.constant 0 : index
    %c2 = arith.constant 2 : index
    %c0_10 = arith.constant 0 : index
    %c0_11 = arith.constant 0 : index
    %7 = vector.load %arg1[%c0_9, %c2, %c0_10, %c0_11] : memref<1x4x75x784xbf16, #tpu.memory_space<vmem>>, vector<1x1x75x784xbf16>
    %8 = vector.shape_cast %7 : vector<1x1x75x784xbf16> to vector<75x784xbf16>
    %cst_12 = arith.constant dense<0.000000e+00> : vector<6x784xf32>
    %9 = tpu.matmul %0, %8, %cst_12 {dimension_numbers = #tpu.dot_dimension_numbers<[1], [0], [0], [1], [0, 0, 1, 1], [], []>} : vector<6x75xbf16>, vector<75x784xbf16>, vector<6x784xf32> -> vector<6x784xf32>
    %c0_13 = arith.constant 0 : index
    %c3 = arith.constant 3 : index
    %c0_14 = arith.constant 0 : index
    %c0_15 = arith.constant 0 : index
    %10 = vector.load %arg1[%c0_13, %c3, %c0_14, %c0_15] : memref<1x4x75x784xbf16, #tpu.memory_space<vmem>>, vector<1x1x75x784xbf16>
    %11 = vector.shape_cast %10 : vector<1x1x75x784xbf16> to vector<75x784xbf16>
    %cst_16 = arith.constant dense<0.000000e+00> : vector<6x784xf32>
    %12 = tpu.matmul %0, %11, %cst_16 {dimension_numbers = #tpu.dot_dimension_numbers<[1], [0], [0], [1], [0, 0, 1, 1], [], []>} : vector<6x75xbf16>, vector<75x784xbf16>, vector<6x784xf32> -> vector<6x784xf32>
    %13 = arith.maximumf %3, %6 : vector<6x784xf32>
    %14 = arith.maximumf %9, %12 : vector<6x784xf32>
    %15 = arith.maximumf %13, %14 : vector<6x784xf32>
    %c0_17 = arith.constant 0 : index
    %c0_18 = arith.constant 0 : index
    %16 = vector.load %arg3[%c0_17, %c0_18] : memref<6x1xf32, #tpu.memory_space<vmem>>, vector<6x1xf32>
    %17 = vector.broadcast %16 : vector<6x1xf32> to vector<6x784xf32>
    %18 = arith.addf %15, %17 : vector<6x784xf32>
    %cst_19 = arith.constant 0.000000e+00 : f32
    %19 = vector.broadcast %cst_19 : f32 to vector<6x784xf32>
    %20 = arith.maximumf %18, %19 : vector<6x784xf32>
    %c0_20 = arith.constant 0 : index
    %c0_21 = arith.constant 0 : index
    %c0_22 = arith.constant 0 : index
    %21 = vector.load %arg4[%c0_20, %c0_21, %c0_22] : memref<1x6x784xf32, #tpu.memory_space<vmem>>, vector<1x6x784xf32>
    %22 = vector.shape_cast %21 : vector<1x6x784xf32> to vector<6x784xf32>
    %23 = vector.shape_cast %20 : vector<6x784xf32> to vector<1x6x784xf32>
    tpu.vector_store %arg4[%c0_20, %c0_21, %c0_22], %23 {strides = array<i32>} : memref<1x6x784xf32, #tpu.memory_space<vmem>>, vector<1x6x784xf32>,
    return
  }
  func.func @transform_0(%arg0: i32) -> (i32, i32, i32, i32) {
    %c0_i32 = arith.constant 0 : i32
    %c0_i32_0 = arith.constant 0 : i32
    %c0_i32_1 = arith.constant 0 : i32
    %c0_i32_2 = arith.constant 0 : i32
    return %arg0, %c0_i32, %c0_i32_0, %c0_i32_1 : i32, i32, i32, i32
  }
  func.func @transform_1(%arg0: i32) -> (i32, i32) {
    %c0_i32 = arith.constant 0 : i32
    %c0_i32_0 = arith.constant 0 : i32
    %c0_i32_1 = arith.constant 0 : i32
    return %c0_i32, %c0_i32_0 : i32, i32
  }
  func.func @transform_2(%arg0: i32) -> (i32, i32) {
    %c0_i32 = arith.constant 0 : i32
    %c0_i32_0 = arith.constant 0 : i32
    %c0_i32_1 = arith.constant 0 : i32
    return %c0_i32, %c0_i32_0 : i32, i32
  }
  func.func @transform_3(%arg0: i32) -> (i32, i32, i32) {
    %c0_i32 = arith.constant 0 : i32
    %c0_i32_0 = arith.constant 0 : i32
    %c0_i32_1 = arith.constant 0 : i32
    return %arg0, %c0_i32, %c0_i32_0 : i32, i32, i32
  }
}

module attributes {stable_mosaic.version = 11 : i64} {
  func.func @_conv_relu_pool_kernel(%arg0: i32, %arg1: memref<1x4x150x100xbf16, #tpu.memory_space<vmem>>, %arg2: memref<16x150xbf16, #tpu.memory_space<vmem>>, %arg3: memref<16x1xf32, #tpu.memory_space<vmem>>, %arg4: memref<1x16x100xf32, #tpu.memory_space<vmem>>) attributes {dimension_semantics = [#tpu.dimension_semantics<parallel>], iteration_bounds = array<i64: 2>, scalar_prefetch = 0 : i64, scratch_operands = 0 : i64, tpu.core_type = #tpu.core_type<tc>, window_params = [{transform_indices = @transform_0, window_bounds = array<i64: 1, 4, 150, 100>}, {pipeline_mode = #tpu.pipeline_mode<synchronous>, transform_indices = @transform_1, window_bounds = array<i64: 16, 150>}, {pipeline_mode = #tpu.pipeline_mode<synchronous>, transform_indices = @transform_2, window_bounds = array<i64: 16, 1>}, {transform_indices = @transform_3, window_bounds = array<i64: 1, 16, 100>}]} {
    %c0 = arith.constant 0 : index
    %c0_0 = arith.constant 0 : index
    %0 = vector.load %arg2[%c0, %c0_0] : memref<16x150xbf16, #tpu.memory_space<vmem>>, vector<16x150xbf16>
    %c0_1 = arith.constant 0 : index
    %c0_2 = arith.constant 0 : index
    %c0_3 = arith.constant 0 : index
    %c0_4 = arith.constant 0 : index
    %1 = vector.load %arg1[%c0_1, %c0_2, %c0_3, %c0_4] : memref<1x4x150x100xbf16, #tpu.memory_space<vmem>>, vector<1x1x150x100xbf16>
    %2 = vector.shape_cast %1 : vector<1x1x150x100xbf16> to vector<150x100xbf16>
    %cst = arith.constant dense<0.000000e+00> : vector<16x100xf32>
    %3 = tpu.matmul %0, %2, %cst {dimension_numbers = #tpu.dot_dimension_numbers<[1], [0], [0], [1], [0, 0, 1, 1], [], []>} : vector<16x150xbf16>, vector<150x100xbf16>, vector<16x100xf32> -> vector<16x100xf32>
    %c0_5 = arith.constant 0 : index
    %c1 = arith.constant 1 : index
    %c0_6 = arith.constant 0 : index
    %c0_7 = arith.constant 0 : index
    %4 = vector.load %arg1[%c0_5, %c1, %c0_6, %c0_7] : memref<1x4x150x100xbf16, #tpu.memory_space<vmem>>, vector<1x1x150x100xbf16>
    %5 = vector.shape_cast %4 : vector<1x1x150x100xbf16> to vector<150x100xbf16>
    %cst_8 = arith.constant dense<0.000000e+00> : vector<16x100xf32>
    %6 = tpu.matmul %0, %5, %cst_8 {dimension_numbers = #tpu.dot_dimension_numbers<[1], [0], [0], [1], [0, 0, 1, 1], [], []>} : vector<16x150xbf16>, vector<150x100xbf16>, vector<16x100xf32> -> vector<16x100xf32>
    %c0_9 = arith.constant 0 : index
    %c2 = arith.constant 2 : index
    %c0_10 = arith.constant 0 : index
    %c0_11 = arith.constant 0 : index
    %7 = vector.load %arg1[%c0_9, %c2, %c0_10, %c0_11] : memref<1x4x150x100xbf16, #tpu.memory_space<vmem>>, vector<1x1x150x100xbf16>
    %8 = vector.shape_cast %7 : vector<1x1x150x100xbf16> to vector<150x100xbf16>
    %cst_12 = arith.constant dense<0.000000e+00> : vector<16x100xf32>
    %9 = tpu.matmul %0, %8, %cst_12 {dimension_numbers = #tpu.dot_dimension_numbers<[1], [0], [0], [1], [0, 0, 1, 1], [], []>} : vector<16x150xbf16>, vector<150x100xbf16>, vector<16x100xf32> -> vector<16x100xf32>
    %c0_13 = arith.constant 0 : index
    %c3 = arith.constant 3 : index
    %c0_14 = arith.constant 0 : index
    %c0_15 = arith.constant 0 : index
    %10 = vector.load %arg1[%c0_13, %c3, %c0_14, %c0_15] : memref<1x4x150x100xbf16, #tpu.memory_space<vmem>>, vector<1x1x150x100xbf16>
    %11 = vector.shape_cast %10 : vector<1x1x150x100xbf16> to vector<150x100xbf16>
    %cst_16 = arith.constant dense<0.000000e+00> : vector<16x100xf32>
    %12 = tpu.matmul %0, %11, %cst_16 {dimension_numbers = #tpu.dot_dimension_numbers<[1], [0], [0], [1], [0, 0, 1, 1], [], []>} : vector<16x150xbf16>, vector<150x100xbf16>, vector<16x100xf32> -> vector<16x100xf32>
    %13 = arith.maximumf %3, %6 : vector<16x100xf32>
    %14 = arith.maximumf %9, %12 : vector<16x100xf32>
    %15 = arith.maximumf %13, %14 : vector<16x100xf32>
    %c0_17 = arith.constant 0 : index
    %c0_18 = arith.constant 0 : index
    %16 = vector.load %arg3[%c0_17, %c0_18] : memref<16x1xf32, #tpu.memory_space<vmem>>, vector<16x1xf32>
    %17 = vector.broadcast %16 : vector<16x1xf32> to vector<16x100xf32>
    %18 = arith.addf %15, %17 : vector<16x100xf32>
    %cst_19 = arith.constant 0.000000e+00 : f32
    %19 = vector.broadcast %cst_19 : f32 to vector<16x100xf32>
    %20 = arith.maximumf %18, %19 : vector<16x100xf32>
    %c0_20 = arith.constant 0 : index
    %c0_21 = arith.constant 0 : index
    %c0_22 = arith.constant 0 : index
    %21 = vector.load %arg4[%c0_20, %c0_21, %c0_22] : memref<1x16x100xf32, #tpu.memory_space<vmem>>, vector<1x16x100xf32>
    %22 = vector.shape_cast %21 : vector<1x16x100xf32> to vector<16x100xf32>
    %23 = vector.shape_cast %20 : vector<16x100xf32> to vector<1x16x100xf32>
    tpu.vector_store %arg4[%c0_20, %c0_21, %c0_22], %23 {strides = array<i32>} : memref<1x16x100xf32, #tpu.memory_space<vmem>>, vector<1x16x100xf32>,
    return
  }
  func.func @transform_0(%arg0: i32) -> (i32, i32, i32, i32) {
    %c0_i32 = arith.constant 0 : i32
    %c0_i32_0 = arith.constant 0 : i32
    %c0_i32_1 = arith.constant 0 : i32
    %c0_i32_2 = arith.constant 0 : i32
    return %arg0, %c0_i32, %c0_i32_0, %c0_i32_1 : i32, i32, i32, i32
  }
  func.func @transform_1(%arg0: i32) -> (i32, i32) {
    %c0_i32 = arith.constant 0 : i32
    %c0_i32_0 = arith.constant 0 : i32
    %c0_i32_1 = arith.constant 0 : i32
    return %c0_i32, %c0_i32_0 : i32, i32
  }
  func.func @transform_2(%arg0: i32) -> (i32, i32) {
    %c0_i32 = arith.constant 0 : i32
    %c0_i32_0 = arith.constant 0 : i32
    %c0_i32_1 = arith.constant 0 : i32
    return %c0_i32, %c0_i32_0 : i32, i32
  }
  func.func @transform_3(%arg0: i32) -> (i32, i32, i32) {
    %c0_i32 = arith.constant 0 : i32
    %c0_i32_0 = arith.constant 0 : i32
    %c0_i32_1 = arith.constant 0 : i32
    return %arg0, %c0_i32, %c0_i32_0 : i32, i32, i32
  }
}

module attributes {stable_mosaic.version = 11 : i64} {
  func.func @_fc_stack_kernel(%arg0: i32, %arg1: memref<8x400xf32, #tpu.memory_space<vmem>>, %arg2: memref<400x128xf32, #tpu.memory_space<vmem>>, %arg3: memref<1x128xf32, #tpu.memory_space<vmem>>, %arg4: memref<128x128xf32, #tpu.memory_space<vmem>>, %arg5: memref<1x128xf32, #tpu.memory_space<vmem>>, %arg6: memref<128x10xf32, #tpu.memory_space<vmem>>, %arg7: memref<1x10xf32, #tpu.memory_space<vmem>>, %arg8: memref<8x10xf32, #tpu.memory_space<vmem>>) attributes {dimension_semantics = [#tpu.dimension_semantics<parallel>], iteration_bounds = array<i64: 1>, scalar_prefetch = 0 : i64, scratch_operands = 0 : i64, tpu.core_type = #tpu.core_type<tc>, window_params = [{transform_indices = @transform_0, window_bounds = array<i64: 8, 400>}, {pipeline_mode = #tpu.pipeline_mode<synchronous>, transform_indices = @transform_1, window_bounds = array<i64: 400, 128>}, {pipeline_mode = #tpu.pipeline_mode<synchronous>, transform_indices = @transform_2, window_bounds = array<i64: 1, 128>}, {pipeline_mode = #tpu.pipeline_mode<synchronous>, transform_indices = @transform_3, window_bounds = array<i64: 128, 128>}, {pipeline_mode = #tpu.pipeline_mode<synchronous>, transform_indices = @transform_4, window_bounds = array<i64: 1, 128>}, {pipeline_mode = #tpu.pipeline_mode<synchronous>, transform_indices = @transform_5, window_bounds = array<i64: 128, 10>}, {pipeline_mode = #tpu.pipeline_mode<synchronous>, transform_indices = @transform_6, window_bounds = array<i64: 1, 10>}, {transform_indices = @transform_7, window_bounds = array<i64: 8, 10>}]} {
    %c0 = arith.constant 0 : index
    %c0_0 = arith.constant 0 : index
    %0 = vector.load %arg1[%c0, %c0_0] : memref<8x400xf32, #tpu.memory_space<vmem>>, vector<8x400xf32>
    %c0_1 = arith.constant 0 : index
    %c0_2 = arith.constant 0 : index
    %1 = vector.load %arg2[%c0_1, %c0_2] : memref<400x128xf32, #tpu.memory_space<vmem>>, vector<400x128xf32>
    %cst = arith.constant dense<0.000000e+00> : vector<8x128xf32>
    %2 = tpu.matmul %0, %1, %cst {dimension_numbers = #tpu.dot_dimension_numbers<[1], [0], [0], [1], [0, 0, 1, 1], [], []>} : vector<8x400xf32>, vector<400x128xf32>, vector<8x128xf32> -> vector<8x128xf32>
    %c0_3 = arith.constant 0 : index
    %c0_4 = arith.constant 0 : index
    %3 = vector.load %arg3[%c0_3, %c0_4] : memref<1x128xf32, #tpu.memory_space<vmem>>, vector<1x128xf32>
    %4 = vector.broadcast %3 : vector<1x128xf32> to vector<8x128xf32>
    %5 = arith.addf %2, %4 : vector<8x128xf32>
    %cst_5 = arith.constant 0.000000e+00 : f32
    %6 = vector.broadcast %cst_5 : f32 to vector<8x128xf32>
    %7 = arith.maximumf %5, %6 : vector<8x128xf32>
    %c0_6 = arith.constant 0 : index
    %c0_7 = arith.constant 0 : index
    %8 = vector.load %arg4[%c0_6, %c0_7] : memref<128x128xf32, #tpu.memory_space<vmem>>, vector<128x128xf32>
    %cst_8 = arith.constant dense<0.000000e+00> : vector<8x128xf32>
    %9 = tpu.matmul %7, %8, %cst_8 {dimension_numbers = #tpu.dot_dimension_numbers<[1], [0], [0], [1], [0, 0, 1, 1], [], []>} : vector<8x128xf32>, vector<128x128xf32>, vector<8x128xf32> -> vector<8x128xf32>
    %c0_9 = arith.constant 0 : index
    %c0_10 = arith.constant 0 : index
    %10 = vector.load %arg5[%c0_9, %c0_10] : memref<1x128xf32, #tpu.memory_space<vmem>>, vector<1x128xf32>
    %11 = vector.broadcast %10 : vector<1x128xf32> to vector<8x128xf32>
    %12 = arith.addf %9, %11 : vector<8x128xf32>
    %cst_11 = arith.constant 0.000000e+00 : f32
    %13 = vector.broadcast %cst_11 : f32 to vector<8x128xf32>
    %14 = arith.maximumf %12, %13 : vector<8x128xf32>
    %c0_12 = arith.constant 0 : index
    %c0_13 = arith.constant 0 : index
    %15 = vector.load %arg6[%c0_12, %c0_13] : memref<128x10xf32, #tpu.memory_space<vmem>>, vector<128x10xf32>
    %cst_14 = arith.constant dense<0.000000e+00> : vector<8x10xf32>
    %16 = tpu.matmul %14, %15, %cst_14 {dimension_numbers = #tpu.dot_dimension_numbers<[1], [0], [0], [1], [0, 0, 1, 1], [], []>} : vector<8x128xf32>, vector<128x10xf32>, vector<8x10xf32> -> vector<8x10xf32>
    %c0_15 = arith.constant 0 : index
    %c0_16 = arith.constant 0 : index
    %17 = vector.load %arg7[%c0_15, %c0_16] : memref<1x10xf32, #tpu.memory_space<vmem>>, vector<1x10xf32>
    %18 = vector.broadcast %17 : vector<1x10xf32> to vector<8x10xf32>
    %19 = arith.addf %16, %18 : vector<8x10xf32>
    %c0_17 = arith.constant 0 : index
    %c0_18 = arith.constant 0 : index
    %20 = vector.load %arg8[%c0_17, %c0_18] : memref<8x10xf32, #tpu.memory_space<vmem>>, vector<8x10xf32>
    tpu.vector_store %arg8[%c0_17, %c0_18], %19 {strides = array<i32>} : memref<8x10xf32, #tpu.memory_space<vmem>>, vector<8x10xf32>,
    return
  }
  func.func @transform_0(%arg0: i32) -> (i32, i32) {
    %c0_i32 = arith.constant 0 : i32
    %c0_i32_0 = arith.constant 0 : i32
    return %arg0, %c0_i32 : i32, i32
  }
  func.func @transform_1(%arg0: i32) -> (i32, i32) {
    %c0_i32 = arith.constant 0 : i32
    %c0_i32_0 = arith.constant 0 : i32
    %c0_i32_1 = arith.constant 0 : i32
    return %c0_i32, %c0_i32_0 : i32, i32
  }
  func.func @transform_2(%arg0: i32) -> (i32, i32) {
    %c0_i32 = arith.constant 0 : i32
    %c0_i32_0 = arith.constant 0 : i32
    %c0_i32_1 = arith.constant 0 : i32
    return %c0_i32, %c0_i32_0 : i32, i32
  }
  func.func @transform_3(%arg0: i32) -> (i32, i32) {
    %c0_i32 = arith.constant 0 : i32
    %c0_i32_0 = arith.constant 0 : i32
    %c0_i32_1 = arith.constant 0 : i32
    return %c0_i32, %c0_i32_0 : i32, i32
  }
  func.func @transform_4(%arg0: i32) -> (i32, i32) {
    %c0_i32 = arith.constant 0 : i32
    %c0_i32_0 = arith.constant 0 : i32
    %c0_i32_1 = arith.constant 0 : i32
    return %c0_i32, %c0_i32_0 : i32, i32
  }
  func.func @transform_5(%arg0: i32) -> (i32, i32) {
    %c0_i32 = arith.constant 0 : i32
    %c0_i32_0 = arith.constant 0 : i32
    %c0_i32_1 = arith.constant 0 : i32
    return %c0_i32, %c0_i32_0 : i32, i32
  }
  func.func @transform_6(%arg0: i32) -> (i32, i32) {
    %c0_i32 = arith.constant 0 : i32
    %c0_i32_0 = arith.constant 0 : i32
    %c0_i32_1 = arith.constant 0 : i32
    return %c0_i32, %c0_i32_0 : i32, i32
  }
  func.func @transform_7(%arg0: i32) -> (i32, i32) {
    %c0_i32 = arith.constant 0 : i32
    %c0_i32_0 = arith.constant 0 : i32
    return %arg0, %c0_i32 : i32, i32
  }
}

</mosaic_0001>

<bundles_post_ra>
// kernel: net_forward.3
= control target key start
LH: loop header
LB: loop body
LE: loop exit
PB: predicated region body
PF: predicated region fallthrough
CT: control target
= control target key end

     0   :  { %s2488_s12 = smov 0   ;;  %s2804_s0 = inlined_call_operand.vmem [shape: bf16[2,4,75,784], index: 0, kind: input, shape index: {}]   ;;  %s2805_s1 = inlined_call_operand.vmem [shape: bf16[6,75], index: 1, kind: input, shape index: {}]   ;;  %s2806_s2 = inlined_call_operand.vmem [shape: f32[6,1], index: 2, kind: input, shape index: {}]   ;;  %s2807_s3 = inlined_call_operand.vmem [shape: f32[2,6,784], index: 3, kind: output, shape index: {}]  }
   0x1 LB: > { %s1876_s13 = sadd.s32 4294967295, %s2462_s12   ;;  %p1880_p0 = scmp.ge.s32.totalorder %s2462_s12, 1  ;;  %s2462_s12 = sphi %s2488_s12, %s13_s12  }
   0x2   : > { %p137_p1 = scmp.lt.s32.totalorder %s2462_s12, 3 }
   0x4   : > { %p138_p2 = pnand %p1880_p0, %p137_p1 }
   0x5   : > { %p161_p3 = scmp.lt.s32.totalorder (!%p138_p2), %s1876_s13, 1 }
   0x6   : > { %141 = sbr.rel (%p138_p2) target bundleno = 382 (0x17e), region = 32 }
   0xb   : > { %vm390_vm0 = vcmask 1044480   ;;  %v2464_v0 = vmov 0   ;;  %s2809_s13 = smov (!%p161_p3, %s1876_s13), 1  ;;  %vm391_vm1 = vcmask 1045504   ;;  %v2465_v1 = vmov 65535  }
   0xc   : > { %447 = vmatprep.mubr.bf16.mxu0 %v2464_v0  ;;  %488 = vmatprep.mubr.bf16.mxu1 %v2464_v0  ;;  %v392_v2 = vsel %vm390_vm0, 4294967295, %v2465_v1  ;;  %s2241_s14 = smul.u32 1120, %s2809_s13  ;;  %v2540_v32 = vld [vmem:[%s2805_s1] sm:$0x7]  ;;  %vm386_vm2 = vcmask 613376   ;;  %v2466_v35 = vmov 0.0  }
   0xd   : > { %2255 = vset.pattern.permute.xlu0 %v2464_v0  ;;  %v2507_v3 = vsel %vm391_vm1, %v392_v2, 0  ;;  %vm2467_vm3 = vmmov 0   ;;  %s2242_s22 = smul.u32 56, %s2809_s13  ;;  %vm1819_vm4 = vcmask 128000  }
   0xe   : > { %s2505_s17 = scalar_lea.vmem %s2804_s0, %s2241_s14 }
   0xf   : > { %v2256_v4 = vld [vmem:[%s2505_s17 + $0xe4] ss:$28 sps:$4 sm:$0x3f]   ;;  %v2258_v5 = vld [vmem:[%s2505_s17 + $0xec] ss:$28 sps:$4 sm:$0x3f]   ;;  %s2789_s25 = scalar_lea.vmem %s2807_s3, %s2242_s22 }
  0x10   : > { %v398_v6 = vand.u32 %v2256_v4, %v2507_v3  ;;  %v2260_v7 = vld [vmem:[%s2505_s17 + $0xe0] ss:$28 sps:$4 sm:$0x3f]   ;;  %v2261_v8 = vld [vmem:[%s2505_s17 + $0xe8] ss:$28 sps:$4 sm:$0x3f]   ;;  %v404_v9 = vand.u32 %v2258_v5, %v2507_v3 }
  0x11   : > { %v2262_v10 = vld [vmem:[%s2505_s17 + $0xac] ss:$28 sps:$4 sm:$0xff]   ;;  %v395_v11 = vand.u32 %v2260_v7, %v2507_v3  ;;  %v401_v12 = vand.u32 %v2261_v8, %v2507_v3  ;;  %v2264_v13 = vld [vmem:[%s2505_s17 + $0xb4] ss:$28 sps:$4 sm:$0xff]   ;;  %v2270_v17 = vld [vmem:[%s2505_s17 + $0x7c] ss:$28 sps:$4 sm:$0xff]  }
  0x12   : > { %421 = vmatprep.subr.bf16.mxu0 %v398_v6  ;;  %462 = vmatprep.subr.bf16.mxu1 %v404_v9  ;;  %v2266_v14 = vld [vmem:[%s2505_s17 + $0xa8] ss:$28 sps:$4 sm:$0xff]   ;;  %v2267_v15 = vld [vmem:[%s2505_s17 + $0xb0] ss:$28 sps:$4 sm:$0xff]   ;;  %v2273_v19 = vld [vmem:[%s2505_s17 + $0x78] ss:$28 sps:$4 sm:$0xff]  }
  0x13   : > { %422 = vmatpush1.bf16.msra.mxu0 %v395_v11  ;;  %463 = vmatpush1.bf16.msra.mxu1 %v401_v12  ;;  %v2268_v16 = vld [vmem:[%s2505_s17 + $0x74] ss:$28 sps:$4 sm:$0xff]   ;;  %v2274_v20 = vld [vmem:[%s2505_s17 + $0x3c] ss:$28 sps:$4 sm:$0xff]   ;;  %v2276_v21 = vld [vmem:[%s2505_s17 + $0x44] ss:$28 sps:$4 sm:$0xff]  }
  0x14   : > { %423 = vmatprep.subr.bf16.mxu0 %v2262_v10  ;;  %464 = vmatprep.subr.bf16.mxu1 %v2264_v13  ;;  %v2272_v18 = vld [vmem:[%s2505_s17 + $0x70] ss:$28 sps:$4 sm:$0xff]   ;;  %v2278_v22 = vld [vmem:[%s2505_s17 + $0x38] ss:$28 sps:$4 sm:$0xff]   ;;  %v2279_v23 = vld [vmem:[%s2505_s17 + $0x40] ss:$28 sps:$4 sm:$0xff]  }
  0x15   : > { %v2280_v24 = vld [vmem:[%s2505_s17 + $0x4] ss:$28 sps:$4 sm:$0xff]   ;;  %v2282_v25 = vld [vmem:[%s2505_s17 + $0xc] ss:$28 sps:$4 sm:$0xff]   ;;  %v2292_v36 = vld [vmem:[%s2505_s17 + $0xbc] ss:$28 sps:$4 sm:$0xff]  }
  0x16   : > { %v2288_v26 = vld [vmem:[%s2505_s17 + $0xf4] ss:$28 sps:$4 sm:$0x3f]   ;;  %v2284_v27 = vld [vmem:[%s2505_s17] ss:$28 sps:$4 sm:$0xff]  }
  0x17   : > { %424 = vmatpush1.bf16.msra.mxu0 %v2266_v14  ;;  %465 = vmatpush1.bf16.msra.mxu1 %v2267_v15  ;;  %v2285_v28 = vld [vmem:[%s2505_s17 + $0x8] ss:$28 sps:$4 sm:$0xff]   ;;  %v2286_v29 = vld [vmem:[%s2505_s17 + $0xf0] ss:$28 sps:$4 sm:$0x3f]   ;;  %v410_v31 = vand.u32 %v2288_v26, %v2507_v3 }
  0x18   : > { %425 = vmatprep.subr.bf16.mxu0 %v2268_v16  ;;  %466 = vmatprep.subr.bf16.mxu1 %v2270_v17  ;;  %v2289_v30 = vld [vmem:[%s2505_s17 + $0xf8] ss:$28 sps:$4 sm:$0x3f]   ;;  %v407_v33 = vand.u32 %v2286_v29, %v2507_v3  ;;  %v2293_v38 = vld [vmem:[%s2505_s17 + $0xc0] ss:$28 sps:$4 sm:$0xff]  }
  0x19   : > { %v413_v34 = vand.u32 %v2289_v30, %v2507_v3  ;;  %v2290_v37 = vld [vmem:[%s2505_s17 + $0xb8] ss:$28 sps:$4 sm:$0xff]   ;;  %v2296_v39 = vld [vmem:[%s2505_s17 + $0x84] ss:$28 sps:$4 sm:$0xff]   ;;  %v2300_v42 = vld [vmem:[%s2505_s17 + $0x4c] ss:$28 sps:$4 sm:$0xff]  }
  0x1a   : > { %v2294_v40 = vld [vmem:[%s2505_s17 + $0x80] ss:$28 sps:$4 sm:$0xff]   ;;  %v2297_v41 = vld [vmem:[%s2505_s17 + $0x88] ss:$28 sps:$4 sm:$0xff]   ;;  %v2301_v44 = vld [vmem:[%s2505_s17 + $0x50] ss:$28 sps:$4 sm:$0xff]  }
  0x1b   : > { %426 = vmatpush1.bf16.msra.mxu0 %v2272_v18  ;;  %467 = vmatpush1.bf16.msra.mxu1 %v2273_v19  ;;  %v2298_v43 = vld [vmem:[%s2505_s17 + $0x48] ss:$28 sps:$4 sm:$0xff]   ;;  %v2304_v45 = vld [vmem:[%s2505_s17 + $0x14] ss:$28 sps:$4 sm:$0xff]   ;;  %v2312_v58 = vld [vmem:[%s2505_s17 + $0x1c0] ss:$28 sps:$4 sm:$0xff]  }
  0x1c   : > { %427 = vmatprep.subr.bf16.mxu0 %v2274_v20  ;;  %468 = vmatprep.subr.bf16.mxu1 %v2276_v21  ;;  %v2308_v46 = vld [vmem:[%s2505_s17 + $0x1fc] ss:$28 sps:$4 sm:$0x3f]   ;;  %v2311_v47 = vld [vmem:[%s2505_s17 + $0x204] ss:$28 sps:$4 sm:$0x3f]  }
  0x1d   : > { %v2302_v48 = vld [vmem:[%s2505_s17 + $0x10] ss:$28 sps:$4 sm:$0xff]   ;;  %v2306_v49 = vld [vmem:[%s2505_s17 + $0x1f8] ss:$28 sps:$4 sm:$0x3f]   ;;  %v796_v52 = vand.u32 %v2308_v46, %v2507_v3  ;;  %v802_v53 = vand.u32 %v2311_v47, %v2507_v3 }
  0x1e   : > { %v2305_v50 = vld [vmem:[%s2505_s17 + $0x18] ss:$28 sps:$4 sm:$0xff]   ;;  %v2309_v51 = vld [vmem:[%s2505_s17 + $0x200] ss:$28 sps:$4 sm:$0x3f]   ;;  %v793_v54 = vand.u32 %v2306_v49, %v2507_v3 }
  0x1f   : > { %428 = vmatpush1.bf16.msra.mxu0 %v2278_v22  ;;  %469 = vmatpush1.bf16.msra.mxu1 %v2279_v23  ;;  %v799_v55 = vand.u32 %v2309_v51, %v2507_v3  ;;  %v2314_v56 = vld [vmem:[%s2505_s17 + $0x1c4] ss:$28 sps:$4 sm:$0xff]   ;;  %v2317_v57 = vld [vmem:[%s2505_s17 + $0x1cc] ss:$28 sps:$4 sm:$0xff]   ;;  %v2323_v61 = vld [vmem:[%s2505_s17 + $0x194] ss:$28 sps:$4 sm:$0xff]  }
  0x20   : > { %429 = vmatprep.subr.bf16.mxu0 %v2280_v24  ;;  %470 = vmatprep.subr.bf16.mxu1 %v2282_v25  ;;  %v2315_v59 = vld [vmem:[%s2505_s17 + $0x1c8] ss:$28 sps:$4 sm:$0xff]   ;;  %v2321_v63 = vld [vmem:[%s2505_s17 + $0x190] ss:$28 sps:$4 sm:$0xff]   ;;  %v2329_v2 = vld [vmem:[%s2505_s17 + $0x15c] ss:$28 sps:$4 sm:$0xff]  }
  0x21   : > { %v2320_v60 = vld [vmem:[%s2505_s17 + $0x18c] ss:$28 sps:$4 sm:$0xff]   ;;  %v2326_v1 = vld [vmem:[%s2505_s17 + $0x154] ss:$28 sps:$4 sm:$0xff]   ;;  %v2332_v6 = vld [vmem:[%s2505_s17 + $0x11c] ss:$28 sps:$4 sm:$0xff]  }
  0x22   : > { %v2318_v62 = vld [vmem:[%s2505_s17 + $0x188] ss:$28 sps:$4 sm:$0xff]   ;;  %v2324_v4 = vld [vmem:[%s2505_s17 + $0x150] ss:$28 sps:$4 sm:$0xff]   ;;  %v2327_v5 = vld [vmem:[%s2505_s17 + $0x158] ss:$28 sps:$4 sm:$0xff]  }
  0x23   : > { %430 = vmatpush1.bf16.msra.mxu0 %v2284_v27  ;;  %471 = vmatpush1.bf16.msra.mxu1 %v2285_v28  ;;  %v2335_v7 = vld [vmem:[%s2505_s17 + $0x124] ss:$28 sps:$4 sm:$0xff]   ;;  %v2338_v8 = vld [vmem:[%s2505_s17 + $0x20c] ss:$28 sps:$4 sm:$0x3f]  }
  0x24   : > { %503 = vmatprep.subr.bf16.mxu0 %v410_v31  ;;  %2185 = vmatprep.subr.bf16.mxu1 %v2466_v35  ;;  %v2330_v9 = vld [vmem:[%s2505_s17 + $0x118] ss:$28 sps:$4 sm:$0xff]   ;;  %v2336_v10 = vld [vmem:[%s2505_s17 + $0x208] ss:$28 sps:$4 sm:$0x3f]   ;;  %v808_v13 = vand.u32 %v2338_v8, %v2507_v3 }
  0x25   : > { %v2333_v11 = vld [vmem:[%s2505_s17 + $0x120] ss:$28 sps:$4 sm:$0xff]   ;;  %v2339_v12 = vld [vmem:[%s2505_s17 + $0x210] ss:$28 sps:$4 sm:$0x3f]   ;;  %v805_v14 = vand.u32 %v2336_v10, %v2507_v3 }
  0x26   : > { %1918 = vmatmul.mubr.msk.bf16.vlgmr.msra.gmra.mxu0 %vm386_vm2, %v2540_v32  ;;  %1919 = vmatmul.mubr.msk.bf16.vlgmr.msra.gmra.mxu1 %vm386_vm2, %v2540_v32  ;;  %v811_v15 = vand.u32 %v2339_v12, %v2507_v3  ;;  %v2342_v16 = vld [vmem:[%s2505_s17 + $0x1d4] ss:$28 sps:$4 sm:$0xff]   ;;  %v2346_v19 = vld [vmem:[%s2505_s17 + $0x19c] ss:$28 sps:$4 sm:$0xff]   ;;  %v2350_v22 = vld [vmem:[%s2505_s17 + $0x164] ss:$28 sps:$4 sm:$0xff]  }
  0x27   : > { %504 = vmatpush1.bf16.msra.mxu0 %v407_v33  ;;  %2186 = vmatpush3.bf16.msra.mxu1 %v413_v34  ;;  %v2340_v17 = vld [vmem:[%s2505_s17 + $0x1d0] ss:$28 sps:$4 sm:$0xff]   ;;  %v2343_v18 = vld [vmem:[%s2505_s17 + $0x1d8] ss:$28 sps:$4 sm:$0xff]   ;;  %v2347_v21 = vld [vmem:[%s2505_s17 + $0x1a0] ss:$28 sps:$4 sm:$0xff]  }
  0x28   : > { %505 = vmatprep.subr.bf16.mxu0 %v2292_v36  ;;  %2187 = vmatprep.subr.bf16.mxu1 %v2466_v35  ;;  %v2344_v20 = vld [vmem:[%s2505_s17 + $0x198] ss:$28 sps:$4 sm:$0xff]   ;;  %v2348_v23 = vld [vmem:[%s2505_s17 + $0x160] ss:$28 sps:$4 sm:$0xff]   ;;  %v2351_v24 = vld [vmem:[%s2505_s17 + $0x168] ss:$28 sps:$4 sm:$0xff]  }
  0x29   : > { %529 = vmatprep.mubr.bf16.mxu0 %v2464_v0  ;;  %2195 = vmatprep.mubr.msk.bf16.mxu1 %vm2467_vm3, %v2466_v35  ;;  %v2358_v25 = vld [vmem:[%s2505_s17 + $0x314] ss:$28 sps:$4 sm:$0x3f]   ;;  %v2361_v26 = vld [vmem:[%s2505_s17 + $0x31c] ss:$28 sps:$4 sm:$0x3f]  }
  0x2a   : > { %v2354_v27 = vld [vmem:[%s2505_s17 + $0x12c] ss:$28 sps:$4 sm:$0xff]   ;;  %v2359_v31 = vld [vmem:[%s2505_s17 + $0x318] ss:$28 sps:$4 sm:$0x3f]   ;;  %v1194_v33 = vand.u32 %v2358_v25, %v2507_v3  ;;  %v1200_v34 = vand.u32 %v2361_v26, %v2507_v3 }
  0x2b   : > { %506 = vmatpush1.bf16.msra.mxu0 %v2290_v37  ;;  %2188 = vmatpush3.bf16.msra.mxu1 %v2293_v38  ;;  %v2352_v28 = vld [vmem:[%s2505_s17 + $0x128] ss:$28 sps:$4 sm:$0xff]   ;;  %v2355_v29 = vld [vmem:[%s2505_s17 + $0x130] ss:$28 sps:$4 sm:$0xff]   ;;  %v1197_v37 = vand.u32 %v2359_v31, %v2507_v3  ;;  %v2364_v38 = vld [vmem:[%s2505_s17 + $0x2dc] ss:$28 sps:$4 sm:$0xff]  }
  0x2c   : > { %507 = vmatprep.subr.bf16.mxu0 %v2296_v39  ;;  %2189 = vmatprep.subr.bf16.mxu1 %v2466_v35  ;;  %v2356_v30 = vld [vmem:[%s2505_s17 + $0x310] ss:$28 sps:$4 sm:$0x3f]   ;;  %v2367_v39 = vld [vmem:[%s2505_s17 + $0x2e4] ss:$28 sps:$4 sm:$0xff]  }
  0x2d   : > { %v1191_v36 = vand.u32 %v2356_v30, %v2507_v3  ;;  %v2376_v46 = vld [vmem:[%s2505_s17 + $0x26c] ss:$28 sps:$4 sm:$0xff]   ;;  %v2379_v47 = vld [vmem:[%s2505_s17 + $0x274] ss:$28 sps:$4 sm:$0xff]   ;;  %v2385_v51 = vld [vmem:[%s2505_s17 + $0x23c] ss:$28 sps:$4 sm:$0xff]  }
  0x2e   : > { %v2377_v49 = vld [vmem:[%s2505_s17 + $0x270] ss:$28 sps:$4 sm:$0xff]   ;;  %v2404_v8 = vld [vmem:[%s2505_s17 + $0x244] ss:$28 sps:$4 sm:$0xff]   ;;  %v2418_v25 = vld [vmem:[%s2505_s17 + $0x3b8] ss:$28 sps:$4 sm:$0xff]  }
  0x2f   : > { %508 = vmatpush1.bf16.msra.mxu0 %v2294_v40  ;;  %2190 = vmatpush3.bf16.msra.mxu1 %v2297_v41  ;;  %v2362_v40 = vld [vmem:[%s2505_s17 + $0x2d8] ss:$28 sps:$4 sm:$0xff]   ;;  %v2365_v41 = vld [vmem:[%s2505_s17 + $0x2e0] ss:$28 sps:$4 sm:$0xff]   ;;  %v2405_v12 = vld [vmem:[%s2505_s17 + $0x248] ss:$28 sps:$4 sm:$0xff]  }
  0x30   : > { %509 = vmatprep.subr.bf16.mxu0 %v2300_v42  ;;  %2191 = vmatprep.subr.bf16.mxu1 %v2466_v35  ;;  %v2370_v42 = vld [vmem:[%s2505_s17 + $0x2a4] ss:$28 sps:$4 sm:$0xff]   ;;  %v2411_v10 = vld [vmem:[%s2505_s17 + $0x434] ss:$28 sps:$4 sm:$0x3f]  }
  0x31   : > { %v2421_v26 = vld [vmem:[%s2505_s17 + $0x3c0] ss:$28 sps:$4 sm:$0xff]   ;;  %v2427_v30 = vld [vmem:[%s2505_s17 + $0x388] ss:$28 sps:$4 sm:$0xff]  }
  0x32   : > { %v2432_v31 = vld [vmem:[%s2505_s17 + $0x34c] ss:$28 sps:$4 sm:$0xff]  }
  0x33   : > { %510 = vmatpush1.bf16.msra.mxu0 %v2298_v43  ;;  %2192 = vmatpush3.bf16.msra.mxu1 %v2301_v44  ;;  %v2373_v43 = vld [vmem:[%s2505_s17 + $0x2ac] ss:$28 sps:$4 sm:$0xff]   ;;  %v2368_v44 = vld [vmem:[%s2505_s17 + $0x2a0] ss:$28 sps:$4 sm:$0xff]  }
  0x34   : > { %511 = vmatprep.subr.bf16.mxu0 %v2304_v45  ;;  %2193 = vmatprep.subr.bf16.mxu1 %v2466_v35  ;;  %v2371_v45 = vld [vmem:[%s2505_s17 + $0x2a8] ss:$28 sps:$4 sm:$0xff]  }
  0x37   : > { %512 = vmatpush1.bf16.msra.mxu0 %v2302_v48  ;;  %2194 = vmatpush3.bf16.msra.mxu1 %v2305_v50  ;;  %v2374_v48 = vld [vmem:[%s2505_s17 + $0x268] ss:$28 sps:$4 sm:$0xff]   ;;  %v2382_v50 = vld [vmem:[%s2505_s17 + $0x234] ss:$28 sps:$4 sm:$0xff]  }
  0x38   : > { %819 = vmatprep.subr.bf16.mxu0 %v796_v52  ;;  %860 = vmatprep.subr.bf16.mxu1 %v802_v53  ;;  %v2388_v52 = vld [vmem:[%s2505_s17 + $0x324] ss:$28 sps:$4 sm:$0x3f]   ;;  %v2380_v53 = vld [vmem:[%s2505_s17 + $0x230] ss:$28 sps:$4 sm:$0xff]  }
  0x3a   : > { %1920 = vmatmul.mubr.msk.bf16.vlgmr.msra.gmra.mxu0 %vm386_vm2, %v2540_v32  ;;  %2196 = vmatmul.mubr.msk.bf16.vlgmr.msra.gmra.mxu1 %vm386_vm2, %v2540_v32 }
  0x3b   : > { %820 = vmatpush1.bf16.msra.mxu0 %v793_v54  ;;  %861 = vmatpush1.bf16.msra.mxu1 %v799_v55  ;;  %v2386_v54 = vld [vmem:[%s2505_s17 + $0x320] ss:$28 sps:$4 sm:$0x3f]   ;;  %v2389_v55 = vld [vmem:[%s2505_s17 + $0x328] ss:$28 sps:$4 sm:$0x3f]  }
  0x3c   : > { %821 = vmatprep.subr.bf16.mxu0 %v2314_v56  ;;  %862 = vmatprep.subr.bf16.mxu1 %v2317_v57  ;;  %v2383_v56 = vld [vmem:[%s2505_s17 + $0x238] ss:$28 sps:$4 sm:$0xff]   ;;  %v1206_v57 = vand.u32 %v2388_v52, %v2507_v3  ;;  %v2455_v52 = vld [vmem:[%s2505_s17 + $0x360] ss:$28 sps:$4 sm:$0xff]  }
  0x3d   : > { %845 = vmatprep.mubr.bf16.mxu0 %v2464_v0  ;;  %886 = vmatprep.mubr.bf16.mxu1 %v2464_v0 }
  0x3f   : > { %822 = vmatpush1.bf16.msra.mxu0 %v2312_v58  ;;  %863 = vmatpush1.bf16.msra.mxu1 %v2315_v59  ;;  %v1793_v58 = vld [vmem:[%s2806_s2] sm:$0x3f]  ;;  %v1203_v59 = vand.u32 %v2386_v54, %v2507_v3 }
  0x40   : > { %823 = vmatprep.subr.bf16.mxu0 %v2320_v60  ;;  %864 = vmatprep.subr.bf16.mxu1 %v2323_v61  ;;  %v1209_v60 = vand.u32 %v2389_v55, %v2507_v3  ;;  %v2392_v61 = vld [vmem:[%s2505_s17 + $0x2ec] ss:$28 sps:$4 sm:$0xff]  }
  0x41   : > { %1796 = vperm.xlu0 %2255, %v1793_v58  }
  0x43   : > { %824 = vmatpush1.bf16.msra.mxu0 %v2318_v62  ;;  %865 = vmatpush1.bf16.msra.mxu1 %v2321_v63  ;;  %v2390_v62 = vld [vmem:[%s2505_s17 + $0x2e8] ss:$28 sps:$4 sm:$0xff]   ;;  %v2393_v63 = vld [vmem:[%s2505_s17 + $0x2f0] ss:$28 sps:$4 sm:$0xff]  }
  0x44   : > { %825 = vmatprep.subr.bf16.mxu0 %v2326_v1  ;;  %866 = vmatprep.subr.bf16.mxu1 %v2329_v2  ;;  %v2396_v1 = vld [vmem:[%s2505_s17 + $0x2b4] ss:$28 sps:$4 sm:$0xff]  }
  0x45   : > { %v2394_v2 = vld [vmem:[%s2505_s17 + $0x2b0] ss:$28 sps:$4 sm:$0xff]  }
  0x47   : > { %826 = vmatpush1.bf16.msra.mxu0 %v2324_v4  ;;  %867 = vmatpush1.bf16.msra.mxu1 %v2327_v5  ;;  %v2397_v4 = vld [vmem:[%s2505_s17 + $0x2b8] ss:$28 sps:$4 sm:$0xff]  }
  0x48   : > { %827 = vmatprep.subr.bf16.mxu0 %v2332_v6  ;;  %868 = vmatprep.subr.bf16.mxu1 %v2335_v7  ;;  %v2400_v5 = vld [vmem:[%s2505_s17 + $0x27c] ss:$28 sps:$4 sm:$0xff]  }
  0x49   : > { %v2398_v6 = vld [vmem:[%s2505_s17 + $0x278] ss:$28 sps:$4 sm:$0xff]   ;;  %v2401_v7 = vld [vmem:[%s2505_s17 + $0x280] ss:$28 sps:$4 sm:$0xff]  }
  0x4b   : > { %828 = vmatpush1.bf16.msra.mxu0 %v2330_v9  ;;  %869 = vmatpush1.bf16.msra.mxu1 %v2333_v11  ;;  %v2408_v9 = vld [vmem:[%s2505_s17 + $0x42c] ss:$28 sps:$4 sm:$0x3f]   ;;  %v2402_v11 = vld [vmem:[%s2505_s17 + $0x240] ss:$28 sps:$4 sm:$0xff]  }
  0x4c   : > { %901 = vmatprep.subr.bf16.mxu0 %v808_v13  ;;  %2199 = vmatprep.subr.bf16.mxu1 %v2466_v35  ;;  %v2406_v13 = vld [vmem:[%s2505_s17 + $0x428] ss:$28 sps:$4 sm:$0x3f]  }
  0x4e   : > { %1997 = vmatmul.mubr.msk.bf16.vlgmr.msra.gmra.mxu0 %vm386_vm2, %v2540_v32  ;;  %1998 = vmatmul.mubr.msk.bf16.vlgmr.msra.gmra.mxu1 %vm386_vm2, %v2540_v32 }
  0x4f   : > { %902 = vmatpush1.bf16.msra.mxu0 %v805_v14  ;;  %2200 = vmatpush3.bf16.msra.mxu1 %v811_v15  ;;  %v2409_v14 = vld [vmem:[%s2505_s17 + $0x430] ss:$28 sps:$4 sm:$0x3f]   ;;  %v1592_v15 = vand.u32 %v2408_v9, %v2507_v3 }
  0x50   : > { %903 = vmatprep.subr.bf16.mxu0 %v2342_v16  ;;  %2201 = vmatprep.subr.bf16.mxu1 %v2466_v35  ;;  %v1598_v16 = vand.u32 %v2411_v10, %v2507_v3 }
  0x51   : > { %927 = vmatprep.mubr.bf16.mxu0 %v2464_v0  ;;  %2209 = vmatprep.mubr.msk.bf16.mxu1 %vm2467_vm3, %v2466_v35 }
  0x53   : > { %904 = vmatpush1.bf16.msra.mxu0 %v2340_v17  ;;  %2202 = vmatpush3.bf16.msra.mxu1 %v2343_v18  ;;  %v1589_v17 = vand.u32 %v2406_v13, %v2507_v3  ;;  %v1595_v18 = vand.u32 %v2409_v14, %v2507_v3 }
  0x54   : > { %905 = vmatprep.subr.bf16.mxu0 %v2346_v19  ;;  %2203 = vmatprep.subr.bf16.mxu1 %v2466_v35  ;;  %v2414_v19 = vld [vmem:[%s2505_s17 + $0x3f4] ss:$28 sps:$4 sm:$0xff]  }
  0x57   : > { %906 = vmatpush1.bf16.msra.mxu0 %v2344_v20  ;;  %2204 = vmatpush3.bf16.msra.mxu1 %v2347_v21  ;;  %v2417_v20 = vld [vmem:[%s2505_s17 + $0x3fc] ss:$28 sps:$4 sm:$0xff]   ;;  %v2412_v21 = vld [vmem:[%s2505_s17 + $0x3f0] ss:$28 sps:$4 sm:$0xff]  }
  0x58   : > { %907 = vmatprep.subr.bf16.mxu0 %v2350_v22  ;;  %2205 = vmatprep.subr.bf16.mxu1 %v2466_v35  ;;  %v2415_v22 = vld [vmem:[%s2505_s17 + $0x3f8] ss:$28 sps:$4 sm:$0xff]  }
  0x5b   : > { %908 = vmatpush1.bf16.msra.mxu0 %v2348_v23  ;;  %2206 = vmatpush3.bf16.msra.mxu1 %v2351_v24  ;;  %v2420_v23 = vld [vmem:[%s2505_s17 + $0x3bc] ss:$28 sps:$4 sm:$0xff]   ;;  %v2423_v24 = vld [vmem:[%s2505_s17 + $0x3c4] ss:$28 sps:$4 sm:$0xff]  }
  0x5c   : > { %909 = vmatprep.subr.bf16.mxu0 %v2354_v27  ;;  %2207 = vmatprep.subr.bf16.mxu1 %v2466_v35  ;;  %v2426_v27 = vld [vmem:[%s2505_s17 + $0x384] ss:$28 sps:$4 sm:$0xff]  }
  0x5f   : > { %910 = vmatpush1.bf16.msra.mxu0 %v2352_v28  ;;  %2208 = vmatpush3.bf16.msra.mxu1 %v2355_v29  ;;  %v2429_v28 = vld [vmem:[%s2505_s17 + $0x38c] ss:$28 sps:$4 sm:$0xff]   ;;  %v2424_v29 = vld [vmem:[%s2505_s17 + $0x380] ss:$28 sps:$4 sm:$0xff]  }
  0x60   : > { %1217 = vmatprep.subr.bf16.mxu0 %v1194_v33  ;;  %1258 = vmatprep.subr.bf16.mxu1 %v1200_v34  ;;  %v2435_v33 = vld [vmem:[%s2505_s17 + $0x354] ss:$28 sps:$4 sm:$0xff]   ;;  %v2438_v34 = vld [vmem:[%s2505_s17 + $0x43c] ss:$28 sps:$4 sm:$0x3f]  }
  0x62   : > { %1999 = vmatmul.mubr.msk.bf16.vlgmr.msra.gmra.mxu0 %vm386_vm2, %v2540_v32  ;;  %2210 = vmatmul.mubr.msk.bf16.vlgmr.msra.gmra.mxu1 %vm386_vm2, %v2540_v32 }
  0x63   : > { %1218 = vmatpush1.bf16.msra.mxu0 %v1191_v36  ;;  %1259 = vmatpush1.bf16.msra.mxu1 %v1197_v37  ;;  %v2430_v36 = vld [vmem:[%s2505_s17 + $0x348] ss:$28 sps:$4 sm:$0xff]   ;;  %v2433_v37 = vld [vmem:[%s2505_s17 + $0x350] ss:$28 sps:$4 sm:$0xff]  }
  0x64   : > { %1219 = vmatprep.subr.bf16.mxu0 %v2364_v38  ;;  %1260 = vmatprep.subr.bf16.mxu1 %v2367_v39  ;;  %v2436_v38 = vld [vmem:[%s2505_s17 + $0x438] ss:$28 sps:$4 sm:$0x3f]   ;;  %v2439_v39 = vld [vmem:[%s2505_s17 + $0x440] ss:$28 sps:$4 sm:$0x3f]  }
  0x65   : > { %1243 = vmatprep.mubr.bf16.mxu0 %v2464_v0  ;;  %1284 = vmatprep.mubr.bf16.mxu1 %v2464_v0 }
  0x67   : > { %1220 = vmatpush1.bf16.msra.mxu0 %v2362_v40  ;;  %1261 = vmatpush1.bf16.msra.mxu1 %v2365_v41  ;;  %v1604_v40 = vand.u32 %v2438_v34, %v2507_v3  ;;  %v1601_v41 = vand.u32 %v2436_v38, %v2507_v3 }
  0x68   : > { %1221 = vmatprep.subr.bf16.mxu0 %v2370_v42  ;;  %1262 = vmatprep.subr.bf16.mxu1 %v2373_v43  ;;  %v1607_v42 = vand.u32 %v2439_v39, %v2507_v3  ;;  %v2442_v43 = vld [vmem:[%s2505_s17 + $0x404] ss:$28 sps:$4 sm:$0xff]   ;;  %v2446_v3 = vld [vmem:[%s2505_s17 + $0x3cc] ss:$28 sps:$4 sm:$0xff]  }
  0x6b   : > { %1222 = vmatpush1.bf16.msra.mxu0 %v2368_v44  ;;  %1263 = vmatpush1.bf16.msra.mxu1 %v2371_v45  ;;  %v2440_v44 = vld [vmem:[%s2505_s17 + $0x400] ss:$28 sps:$4 sm:$0xff]   ;;  %v2443_v45 = vld [vmem:[%s2505_s17 + $0x408] ss:$28 sps:$4 sm:$0xff]  }
  0x6c   : > { %1223 = vmatprep.subr.bf16.mxu0 %v2376_v46  ;;  %1264 = vmatprep.subr.bf16.mxu1 %v2379_v47  ;;  %v2444_v46 = vld [vmem:[%s2505_s17 + $0x3c8] ss:$28 sps:$4 sm:$0xff]   ;;  %v2447_v47 = vld [vmem:[%s2505_s17 + $0x3d0] ss:$28 sps:$4 sm:$0xff]  }
  0x6f   : > { %1224 = vmatpush1.bf16.msra.mxu0 %v2374_v48  ;;  %1265 = vmatpush1.bf16.msra.mxu1 %v2377_v49  ;;  %v2450_v48 = vld [vmem:[%s2505_s17 + $0x394] ss:$28 sps:$4 sm:$0xff]  }
  0x70   : > { %1225 = vmatprep.subr.bf16.mxu0 %v2382_v50  ;;  %1266 = vmatprep.subr.bf16.mxu1 %v2385_v51  ;;  %v2448_v49 = vld [vmem:[%s2505_s17 + $0x390] ss:$28 sps:$4 sm:$0xff]   ;;  %v2451_v50 = vld [vmem:[%s2505_s17 + $0x398] ss:$28 sps:$4 sm:$0xff]  }
  0x71   : > { %v2452_v51 = vld [vmem:[%s2505_s17 + $0x358] ss:$28 sps:$4 sm:$0xff]  }
  0x73   : > { %1226 = vmatpush1.bf16.msra.mxu0 %v2380_v53  ;;  %1267 = vmatpush1.bf16.msra.mxu1 %v2383_v56 }
  0x74   : > { %1299 = vmatprep.subr.bf16.mxu0 %v1206_v57  ;;  %2213 = vmatprep.subr.bf16.mxu1 %v2466_v35 }
  0x76   : > { %2076 = vmatmul.mubr.msk.bf16.vlgmr.msra.gmra.mxu0 %vm386_vm2, %v2540_v32  ;;  %2077 = vmatmul.mubr.msk.bf16.vlgmr.msra.gmra.mxu1 %vm386_vm2, %v2540_v32 }
  0x77   : > { %1300 = vmatpush1.bf16.msra.mxu0 %v1203_v59  ;;  %2214 = vmatpush3.bf16.msra.mxu1 %v1209_v60 }
  0x78   : > { %1301 = vmatprep.subr.bf16.mxu0 %v2392_v61  ;;  %2215 = vmatprep.subr.bf16.mxu1 %v2466_v35 }
  0x79   : > { %1325 = vmatprep.mubr.bf16.mxu0 %v2464_v0  ;;  %2223 = vmatprep.mubr.msk.bf16.mxu1 %vm2467_vm3, %v2466_v35 }
  0x7b   : > { %1302 = vmatpush1.bf16.msra.mxu0 %v2390_v62  ;;  %2216 = vmatpush3.bf16.msra.mxu1 %v2393_v63 }
  0x7c   : > { %1303 = vmatprep.subr.bf16.mxu0 %v2396_v1  ;;  %2217 = vmatprep.subr.bf16.mxu1 %v2466_v35 }
  0x7f   : > { %1304 = vmatpush1.bf16.msra.mxu0 %v2394_v2  ;;  %2218 = vmatpush3.bf16.msra.mxu1 %v2397_v4 }
  0x80   : > { %1305 = vmatprep.subr.bf16.mxu0 %v2400_v5  ;;  %2219 = vmatprep.subr.bf16.mxu1 %v2466_v35 }
  0x83   : > { %1306 = vmatpush1.bf16.msra.mxu0 %v2398_v6  ;;  %2220 = vmatpush3.bf16.msra.mxu1 %v2401_v7 }
  0x84   : > { %1307 = vmatprep.subr.bf16.mxu0 %v2404_v8  ;;  %2221 = vmatprep.subr.bf16.mxu1 %v2466_v35 }
  0x87   : > { %1308 = vmatpush1.bf16.msra.mxu0 %v2402_v11  ;;  %2222 = vmatpush3.bf16.msra.mxu1 %v2405_v12 }
  0x88   : > { %1615 = vmatprep.subr.bf16.mxu0 %v1592_v15  ;;  %1656 = vmatprep.subr.bf16.mxu1 %v1598_v16 }
  0x8a   : > { %2078 = vmatmul.mubr.msk.bf16.vlgmr.msra.gmra.mxu0 %vm386_vm2, %v2540_v32  ;;  %2224 = vmatmul.mubr.msk.bf16.vlgmr.msra.gmra.mxu1 %vm386_vm2, %v2540_v32 }
  0x8b   : > { %1616 = vmatpush1.bf16.msra.mxu0 %v1589_v17  ;;  %1657 = vmatpush1.bf16.msra.mxu1 %v1595_v18 }
  0x8c   : > { %1617 = vmatprep.subr.bf16.mxu0 %v2414_v19  ;;  %1658 = vmatprep.subr.bf16.mxu1 %v2417_v20 }
  0x8d   : > { %1641 = vmatprep.mubr.bf16.mxu0 %v2464_v0  ;;  %1682 = vmatprep.mubr.bf16.mxu1 %v2464_v0 }
  0x8f   : > { %1618 = vmatpush1.bf16.msra.mxu0 %v2412_v21  ;;  %1659 = vmatpush1.bf16.msra.mxu1 %v2415_v22 }
  0x90   : > { %1619 = vmatprep.subr.bf16.mxu0 %v2420_v23  ;;  %1660 = vmatprep.subr.bf16.mxu1 %v2423_v24 }
  0x93   : > { %1620 = vmatpush1.bf16.msra.mxu0 %v2418_v25  ;;  %1661 = vmatpush1.bf16.msra.mxu1 %v2421_v26 }
  0x94   : > { %1621 = vmatprep.subr.bf16.mxu0 %v2426_v27  ;;  %1662 = vmatprep.subr.bf16.mxu1 %v2429_v28 }
  0x97   : > { %1622 = vmatpush1.bf16.msra.mxu0 %v2424_v29  ;;  %1663 = vmatpush1.bf16.msra.mxu1 %v2427_v30 }
  0x98   : > { %1623 = vmatprep.subr.bf16.mxu0 %v2432_v31  ;;  %1664 = vmatprep.subr.bf16.mxu1 %v2435_v33 }
  0x9b   : > { %1624 = vmatpush1.bf16.msra.mxu0 %v2430_v36  ;;  %1665 = vmatpush1.bf16.msra.mxu1 %v2433_v37 }
  0x9c   : > { %1697 = vmatprep.subr.bf16.mxu0 %v1604_v40  ;;  %2227 = vmatprep.subr.bf16.mxu1 %v2466_v35 }
  0x9e   : > { %2155 = vmatmul.mubr.msk.bf16.vlgmr.msra.gmra.mxu0 %vm386_vm2, %v2540_v32  ;;  %2156 = vmatmul.mubr.msk.bf16.vlgmr.msra.gmra.mxu1 %vm386_vm2, %v2540_v32 }
  0x9f   : > { %1698 = vmatpush1.bf16.msra.mxu0 %v1601_v41  ;;  %2228 = vmatpush3.bf16.msra.mxu1 %v1607_v42 }
  0xa0   : > { %1699 = vmatprep.subr.bf16.mxu0 %v2442_v43  ;;  %2229 = vmatprep.subr.bf16.mxu1 %v2466_v35 }
  0xa1   : > { %1723 = vmatprep.mubr.bf16.mxu0 %v2464_v0  ;;  %2237 = vmatprep.mubr.msk.bf16.mxu1 %vm2467_vm3, %v2466_v35  ;;  %v2454_v0 = vld [vmem:[%s2505_s17 + $0x35c] ss:$28 sps:$4 sm:$0xff]  }
  0xa3   : > { %1700 = vmatpush1.bf16.msra.mxu0 %v2440_v44  ;;  %2230 = vmatpush3.bf16.msra.mxu1 %v2443_v45 }
  0xa4   : > { %1701 = vmatprep.subr.bf16.mxu0 %v2446_v3  ;;  %2231 = vmatprep.subr.bf16.mxu1 %v2466_v35 }
  0xa7   : > { %1702 = vmatpush1.bf16.msra.mxu0 %v2444_v46  ;;  %2232 = vmatpush3.bf16.msra.mxu1 %v2447_v47 }
  0xa8   : > { %1703 = vmatprep.subr.bf16.mxu0 %v2450_v48  ;;  %2233 = vmatprep.subr.bf16.mxu1 %v2466_v35 }
  0xab   : > { %1704 = vmatpush1.bf16.msra.mxu0 %v2448_v49  ;;  %2234 = vmatpush3.bf16.msra.mxu1 %v2451_v50 }
  0xac   : > { %1705 = vmatprep.subr.bf16.mxu0 %v2454_v0  ;;  %2235 = vmatprep.subr.bf16.mxu1 %v2466_v35 }
  0xaf   : > { %1706 = vmatpush1.bf16.msra.mxu0 %v2452_v51  ;;  %2236 = vmatpush3.bf16.msra.mxu1 %v2455_v52 }
  0xb2   : > { %2157 = vmatmul.mubr.msk.bf16.vlgmr.msra.gmra.mxu0 %vm386_vm2, %v2540_v32  ;;  %2238 = vmatmul.mubr.msk.bf16.vlgmr.msra.gmra.mxu1 %vm386_vm2, %v2540_v32 }
  0xbc   : > { %v1797_v49 = vpop.permute.xlu0 %1796 }
  0xe6   : > { %v2755_v53 = vpop.f32.mrf.mxu0  ;;  %v2757_v54 = vpop.f32.mrf.mxu1 }
  0xe8   : > { %v2759_v55 = vpop.f32.mrf.mxu0  ;;  %v2761_v56 = vpop.f32.mrf.mxu1 }
  0xea   : > { %v453_v57 = vpop.f32.mrf.mxu0  ;;  %v494_v58 = vpop.f32.mrf.mxu1 }
  0xec   : > { %v454_v59 = vpop.f32.mrf.mxu0  ;;  %v495_v35 = vpop.f32.mrf.mxu1 }
  0xfa   : > { %v2763_v60 = vpop.f32.mrf.mxu0  ;;  %v2765_v61 = vpop.f32.mrf.mxu1 }
  0xfc   : > { %v2767_v62 = vpop.f32.mrf.mxu0  ;;  %v2197_v63 = vpop.f32.mrf.mxu1 }
  0xfe   : > { %v535_v32 = vpop.f32.mrf.mxu0  ;;  %v575_v1 = vpop.f32.mrf.mxu1 }
 0x100   : > { %v536_v2 = vpop.f32.mrf.mxu0  ;;  %v2198_v4 = vpop.f32.mrf.mxu1 }
 0x10e   : > { %v847_v5 = vpop.f32.mrf.mxu0  ;;  %v888_v6 = vpop.f32.mrf.mxu1 }
 0x10f   : > { %v1772_v7 = vmax.f32 %v2755_v53, %v847_v5  ;;  %v1774_v8 = vmax.f32 %v2757_v54, %v888_v6 }
 0x110   : > { %v849_v9 = vpop.f32.mrf.mxu0  ;;  %v890_v10 = vpop.f32.mrf.mxu1 }
 0x111   : > { %v1773_v11 = vmax.f32 %v2759_v55, %v849_v9  ;;  %v1775_v12 = vmax.f32 %v2761_v56, %v890_v10 }
 0x112   : > { %v851_v13 = vpop.f32.mrf.mxu0  ;;  %v892_v14 = vpop.f32.mrf.mxu1 }
 0x114   : > { %v852_v15 = vpop.f32.mrf.mxu0  ;;  %v893_v16 = vpop.f32.mrf.mxu1 }
 0x122   : > { %v2773_v17 = vpop.f32.mrf.mxu0  ;;  %v2775_v18 = vpop.f32.mrf.mxu1 }
 0x123   : > { %v1776_v19 = vmax.f32 %v2763_v60, %v2773_v17  ;;  %v1778_v20 = vmax.f32 %v2765_v61, %v2775_v18 }
 0x124   : > { %v2781_v21 = vpop.f32.mrf.mxu0  ;;  %v2211_v22 = vpop.f32.mrf.mxu1 }
 0x125   : > { %v1777_v23 = vmax.f32 %v2767_v62, %v2781_v21 }
 0x126   : > { %v933_v24 = vpop.f32.mrf.mxu0  ;;  %v973_v25 = vpop.f32.mrf.mxu1 }
 0x128   : > { %v934_v26 = vpop.f32.mrf.mxu0  ;;  %v2212_v27 = vpop.f32.mrf.mxu1 }
 0x136   : > { %v1245_v28 = vpop.f32.mrf.mxu0  ;;  %v1286_v29 = vpop.f32.mrf.mxu1 }
 0x138   : > { %v1247_v30 = vpop.f32.mrf.mxu0  ;;  %v1288_v31 = vpop.f32.mrf.mxu1 }
 0x13a   : > { %v1249_v33 = vpop.f32.mrf.mxu0  ;;  %v1290_v34 = vpop.f32.mrf.mxu1 }
 0x13c   : > { %v1250_v36 = vpop.f32.mrf.mxu0  ;;  %v1291_v37 = vpop.f32.mrf.mxu1 }
 0x14a   : > { %v1327_v38 = vpop.f32.mrf.mxu0  ;;  %v1368_v39 = vpop.f32.mrf.mxu1 }
 0x14c   : > { %v1329_v40 = vpop.f32.mrf.mxu0  ;;  %v2225_v41 = vpop.f32.mrf.mxu1 }
 0x14e   : > { %v1331_v42 = vpop.f32.mrf.mxu0  ;;  %v1371_v43 = vpop.f32.mrf.mxu1 }
 0x150   : > { %v1332_v44 = vpop.f32.mrf.mxu0  ;;  %v2226_v45 = vpop.f32.mrf.mxu1 }
 0x15e   : > { %v1643_v3 = vpop.f32.mrf.mxu0  ;;  %v1684_v46 = vpop.f32.mrf.mxu1 }
 0x15f   : > { %v1779_v47 = vmax.f32 %v1245_v28, %v1643_v3  ;;  %v1781_v48 = vmax.f32 %v1286_v29, %v1684_v46 }
 0x160   : > { %v1645_v50 = vpop.f32.mrf.mxu0  ;;  %v1686_v0 = vpop.f32.mrf.mxu1 }
 0x161   : > { %v1786_v51 = vmax.f32 %v1772_v7, %v1779_v47  ;;  %v1788_v52 = vmax.f32 %v1774_v8, %v1781_v48  ;;  %v1780_v53 = vmax.f32 %v1247_v30, %v1645_v50  ;;  %v1782_v54 = vmax.f32 %v1288_v31, %v1686_v0 }
 0x162   : > { %v1647_v55 = vpop.f32.mrf.mxu0  ;;  %v1688_v56 = vpop.f32.mrf.mxu1 }
 0x163   : > { %v1787_v57 = vmax.f32 %v1773_v11, %v1780_v53  ;;  %v1789_v58 = vmax.f32 %v1775_v12, %v1782_v54  ;;  %v1799_v59 = vadd.f32 %v1797_v49, %v1786_v51  ;;  %v1801_v35 = vadd.f32 %v1797_v49, %v1788_v52 }
 0x164   : > { %v1648_v60 = vpop.f32.mrf.mxu0  ;;  %v1689_v61 = vpop.f32.mrf.mxu1 }
 0x165   : > { %v1800_v63 = vadd.f32 %v1797_v49, %v1787_v57  ;;  %v1802_v32 = vadd.f32 %v1797_v49, %v1789_v58  ;;  %v1806_v1 = vmax.f32 %v1799_v59, 0.0  ;;  %v1808_v2 = vmax.f32 %v1801_v35, 0.0 }
 0x167   : > { %v1807_v4 = vmax.f32 %v1800_v63, 0.0  ;;  %v1809_v5 = vmax.f32 %v1802_v32, 0.0  ;;  %1813 = vst [vmem:[%s2789_s25] sm:$0x3f] %v1806_v1  ;;  %1815 = vst [vmem:[%s2789_s25 + $0x10] sm:$0x3f] %v1808_v2 }
 0x169   : > { %1814 = vst [vmem:[%s2789_s25 + $0x8] sm:$0x3f] %v1807_v4  ;;  %1816 = vst [vmem:[%s2789_s25 + $0x18] sm:$0x3f] %v1809_v5 }
 0x172   : > { %v1725_v6 = vpop.f32.mrf.mxu0  ;;  %v1766_v7 = vpop.f32.mrf.mxu1 }
 0x173   : > { %v1783_v8 = vmax.f32 %v1327_v38, %v1725_v6  ;;  %v1785_v9 = vmax.f32 %v1368_v39, %v1766_v7 }
 0x174   : > { %v1727_v10 = vpop.f32.mrf.mxu0  ;;  %v2239_v11 = vpop.f32.mrf.mxu1 }
 0x175   : > { %v1790_v12 = vmax.f32 %v1776_v19, %v1783_v8  ;;  %v1792_v13 = vmax.f32 %v1778_v20, %v1785_v9  ;;  %v1784_v14 = vmax.f32 %v1329_v40, %v1727_v10 }
 0x176   : > { %v1729_v15 = vpop.f32.mrf.mxu0  ;;  %v1769_v16 = vpop.f32.mrf.mxu1 }
 0x177   : > { %v1803_v17 = vadd.f32 %v1797_v49, %v1790_v12  ;;  %v1805_v18 = vadd.f32 %v1797_v49, %v1792_v13  ;;  %v1791_v22 = vmax.f32 %v1777_v23, %v1784_v14 }
 0x178   : > { %v1730_v24 = vpop.f32.mrf.mxu0  ;;  %v2240_v25 = vpop.f32.mrf.mxu1 }
 0x179   : > { %v1810_v26 = vmax.f32 %v1803_v17, 0.0  ;;  %v1812_v27 = vmax.f32 %v1805_v18, 0.0  ;;  %v1804_v28 = vadd.f32 %v1797_v49, %v1791_v22 }
 0x17b   : > { %1817 = vst [vmem:[%s2789_s25 + $0x20] sm:$0x3f] %v1810_v26  ;;  %1820 = vst.msk [vmem:[%s2789_s25 + $0x30] sm:$0x3f] %vm1819_vm4, %v1812_v27  ;;  %v1811_v19 = vmax.f32 %v1804_v28, 0.0 }
 0x17d   : > { %1818 = vst [vmem:[%s2789_s25 + $0x28] sm:$0x3f] %v1811_v19 }
 0x17e PF: > { %s13_s12 = sadd.s32 1, %s2462_s12  }
 0x17f   : > { %p10_p4 = scmp.ge.s32.totalorder %s13_s12, 4  }
 0x181   :  { %12 = sbr.rel (!%p10_p4) target bundleno = 1 (0x1), region = 65 }

// kernel: net_forward.4
= control target key start
LH: loop header
LB: loop body
LE: loop exit
PB: predicated region body
PF: predicated region fallthrough
CT: control target
= control target key end

     0   :  { %s948_s12 = smov 0   ;;  %s1084_s0 = inlined_call_operand.vmem [shape: bf16[2,4,150,100], index: 0, kind: input, shape index: {}]   ;;  %s1085_s1 = inlined_call_operand.vmem [shape: bf16[16,150], index: 1, kind: input, shape index: {}]   ;;  %s1086_s2 = inlined_call_operand.vmem [shape: f32[16,1], index: 2, kind: input, shape index: {}]   ;;  %s1087_s3 = inlined_call_operand.vmem [shape: f32[2,16,100], index: 3, kind: output, shape index: {}]  }
   0x1 LB: > { %s751_s13 = sadd.s32 4294967295, %s925_s12   ;;  %p755_p0 = scmp.ge.s32.totalorder %s925_s12, 1  ;;  %s925_s12 = sphi %s948_s12, %s13_s12  }
   0x2   : > { %p137_p1 = scmp.lt.s32.totalorder %s925_s12, 3 }
   0x4   : > { %p138_p2 = pnand %p755_p0, %p137_p1 }
   0x5   : > { %p161_p3 = scmp.lt.s32.totalorder (!%p138_p2), %s751_s13, 1 }
   0x6   : > { %141 = sbr.rel (%p138_p2) target bundleno = 301 (0x12d), region = 32 }
   0xb   : > { %vm259_vm0 = vcmask 179200   ;;  %v927_v0 = vmov 0   ;;  %v961_v1 = vld [vmem:[%s1085_s1 + $0x4] ss:$8 sps:$4 sm:$0xff]   ;;  %s1089_s13 = smov (!%p161_p3, %s751_s13), 1  ;;  %vm263_vm1 = vcmask 1042432  }
   0xc   : > { %267 = vmatprep.subr.bf16.mxu0 %v927_v0  ;;  %388 = vmatprep.subr.bf16.mxu1 %v927_v0  ;;  %v677_v2 = vld [vmem:[%s1086_s2] sm:$0xff]  ;;  %s865_s18 = smul.u32 304, %s1089_s13  ;;  %v678_v3 = vld [vmem:[%s1086_s2 + $0x8] sm:$0xff]  ;;  %s864_s26 = sshll.u32 %s1089_s13, 4  ;;  %vm693_vm2 = vcmask 818176  }
   0xd   : > { %875 = vset.pattern.permute.xlu0 %v927_v0  ;;  %771 = vmatprep.mubr.msk.bf16.mxu0 %vm259_vm0, %v961_v1  ;;  %v1025_v26 = vld [vmem:[%s1085_s1] ss:$8 sps:$4 sm:$0xff]   ;;  %s170_s29 = scalar_lea.vmem %s1087_s3, %s864_s26 }
   0xe   : > { %801 = vmatprep.mubr.msk.bf16.mxu1 %vm259_vm0, %v961_v1  ;;  %681 = vperm.xlu0 %875, %v677_v2   ;;  %s980_s23 = scalar_lea.vmem %s1084_s0, %s865_s18 }
   0xf   : > { %v876_v4 = vld [vmem:[%s980_s23 + $0x38] sm:$0xff]   ;;  %v877_v5 = vld [vmem:[%s980_s23 + $0x84] sm:$0xff]   ;;  %v878_v6 = vld [vmem:[%s980_s23 + $0x30] sm:$0xff]  }
  0x10   : > { %268 = vmatpush1.bf16.msra.mxu0 %v876_v4  ;;  %389 = vmatpush1.bf16.msra.mxu1 %v877_v5  ;;  %v879_v7 = vld [vmem:[%s980_s23 + $0x7c] sm:$0xff]   ;;  %v880_v8 = vld [vmem:[%s980_s23 + $0x28] sm:$0xff]   ;;  %v881_v9 = vld [vmem:[%s980_s23 + $0x74] sm:$0xff]  }
  0x11   : > { %269 = vmatprep.subr.bf16.mxu0 %v927_v0  ;;  %390 = vmatprep.subr.bf16.mxu1 %v927_v0  ;;  %v882_v10 = vld [vmem:[%s980_s23 + $0x20] sm:$0xff]   ;;  %v883_v11 = vld [vmem:[%s980_s23 + $0x6c] sm:$0xff]   ;;  %v884_v12 = vld [vmem:[%s980_s23 + $0x18] sm:$0xff]  }
  0x12   : > { %686 = vperm.xlu0 %875, %v678_v3   ;;  %v885_v13 = vld [vmem:[%s980_s23 + $0x64] sm:$0xff]   ;;  %v886_v14 = vld [vmem:[%s980_s23 + $0x10] sm:$0xff]   ;;  %v887_v15 = vld [vmem:[%s980_s23 + $0x5c] sm:$0xff]  }
  0x13   : > { %v888_v16 = vld [vmem:[%s980_s23 + $0x8] sm:$0xff]   ;;  %v889_v17 = vld [vmem:[%s980_s23 + $0x54] sm:$0xff]   ;;  %v890_v19 = vld [vmem:[%s980_s23] sm:$0xff]  }
  0x14   : > { %270 = vmatpush1.bf16.msra.mxu0 %v878_v6  ;;  %391 = vmatpush1.bf16.msra.mxu1 %v879_v7  ;;  %v892_v18 = vld [vmem:[%s980_s23 + $0x48] ss:$0 sps:$4 sm:$0x77]   ;;  %v893_v20 = vld [vmem:[%s980_s23 + $0x94] ss:$0 sps:$4 sm:$0x77]  }
  0x15   : > { %271 = vmatprep.subr.bf16.mxu0 %v927_v0  ;;  %392 = vmatprep.subr.bf16.mxu1 %v927_v0  ;;  %v891_v21 = vld [vmem:[%s980_s23 + $0x4c] sm:$0xff]   ;;  %v265_v22 = vsel %vm263_vm1, %v892_v18, 0  ;;  %v386_v23 = vsel %vm263_vm1, %v893_v20, 0  ;;  %v894_v24 = vld [vmem:[%s980_s23 + $0x40] sm:$0xff]   ;;  %v902_v30 = vld [vmem:[%s980_s23 + $0x114] sm:$0xff]  }
  0x16   : > { %v895_v25 = vld [vmem:[%s980_s23 + $0x8c] sm:$0xff]   ;;  %v900_v28 = vld [vmem:[%s980_s23 + $0x11c] sm:$0xff]   ;;  %v906_v34 = vld [vmem:[%s980_s23 + $0x104] sm:$0xff]  }
  0x17   : > { %v899_v27 = vld [vmem:[%s980_s23 + $0xd0] sm:$0xff]   ;;  %v901_v29 = vld [vmem:[%s980_s23 + $0xc8] sm:$0xff]   ;;  %v903_v31 = vld [vmem:[%s980_s23 + $0xc0] sm:$0xff]  }
  0x18   : > { %272 = vmatpush1.bf16.msra.mxu0 %v880_v8  ;;  %393 = vmatpush1.bf16.msra.mxu1 %v881_v9  ;;  %v904_v32 = vld [vmem:[%s980_s23 + $0x10c] sm:$0xff]   ;;  %v905_v33 = vld [vmem:[%s980_s23 + $0xb8] sm:$0xff]   ;;  %v911_v39 = vld [vmem:[%s980_s23 + $0xa0] sm:$0xff]  }
  0x19   : > { %273 = vmatprep.subr.bf16.mxu0 %v927_v0  ;;  %394 = vmatprep.subr.bf16.mxu1 %v927_v0  ;;  %v907_v35 = vld [vmem:[%s980_s23 + $0xb0] sm:$0xff]   ;;  %v908_v36 = vld [vmem:[%s980_s23 + $0xfc] sm:$0xff]   ;;  %v909_v37 = vld [vmem:[%s980_s23 + $0xa8] sm:$0xff]  }
  0x1a   : > { %v910_v38 = vld [vmem:[%s980_s23 + $0xf4] sm:$0xff]   ;;  %v912_v40 = vld [vmem:[%s980_s23 + $0xec] sm:$0xff]   ;;  %v914_v42 = vld [vmem:[%s980_s23 + $0xe4] sm:$0xff]  }
  0x1b   : > { %v913_v41 = vld [vmem:[%s980_s23 + $0x98] sm:$0xff]   ;;  %v915_v43 = vld [vmem:[%s980_s23 + $0xe0] ss:$0 sps:$4 sm:$0x77]   ;;  %v918_v48 = vld [vmem:[%s980_s23 + $0x124] sm:$0xff]  }
  0x1c   : > { %274 = vmatpush1.bf16.msra.mxu0 %v882_v10  ;;  %395 = vmatpush1.bf16.msra.mxu1 %v883_v11  ;;  %v916_v44 = vld [vmem:[%s980_s23 + $0x12c] ss:$0 sps:$4 sm:$0x77]   ;;  %v507_v45 = vsel %vm263_vm1, %v915_v43, 0  ;;  %v917_v47 = vld [vmem:[%s980_s23 + $0xd8] sm:$0xff]  }
  0x1d   : > { %275 = vmatprep.subr.bf16.mxu0 %v927_v0  ;;  %396 = vmatprep.subr.bf16.mxu1 %v927_v0  ;;  %v628_v46 = vsel %vm263_vm1, %v916_v44, 0 }
  0x20   : > { %276 = vmatpush1.bf16.msra.mxu0 %v884_v12  ;;  %397 = vmatpush1.bf16.msra.mxu1 %v885_v13 }
  0x21   : > { %277 = vmatprep.subr.bf16.mxu0 %v927_v0  ;;  %398 = vmatprep.subr.bf16.mxu1 %v927_v0 }
  0x24   : > { %278 = vmatpush1.bf16.msra.mxu0 %v886_v14  ;;  %399 = vmatpush1.bf16.msra.mxu1 %v887_v15 }
  0x25   : > { %279 = vmatprep.subr.bf16.mxu0 %v927_v0  ;;  %400 = vmatprep.subr.bf16.mxu1 %v927_v0 }
  0x28   : > { %280 = vmatpush1.bf16.msra.mxu0 %v888_v16  ;;  %401 = vmatpush1.bf16.msra.mxu1 %v889_v17 }
  0x29   : > { %281 = vmatprep.subr.bf16.mxu0 %v927_v0  ;;  %402 = vmatprep.subr.bf16.mxu1 %v927_v0 }
  0x2c   : > { %282 = vmatpush1.bf16.msra.mxu0 %v890_v19  ;;  %403 = vmatpush1.bf16.msra.mxu1 %v891_v21 }
  0x2d   : > { %295 = vmatprep.subr.bf16.mxu0 %v927_v0  ;;  %416 = vmatprep.subr.bf16.mxu1 %v927_v0 }
  0x30   : > { %296 = vmatpush2.bf16.msra.mxu0 %v265_v22  ;;  %417 = vmatpush2.bf16.msra.mxu1 %v386_v23 }
  0x31   : > { %297 = vmatprep.subr.bf16.mxu0 %v927_v0  ;;  %418 = vmatprep.subr.bf16.mxu1 %v927_v0 }
  0x34   : > { %298 = vmatpush2.bf16.msra.mxu0 %v894_v24  ;;  %419 = vmatpush2.bf16.msra.mxu1 %v895_v25 }
  0x35   : > { %509 = vmatprep.subr.bf16.mxu0 %v927_v0  ;;  %630 = vmatprep.subr.bf16.mxu1 %v927_v0 }
  0x37   : > { %300 = vmatmul.mubr.bf16.vlgmr.msra.gmra.mxu0 %v1025_v26  ;;  %421 = vmatmul.mubr.bf16.vlgmr.msra.gmra.mxu1 %v1025_v26 }
  0x38   : > { %510 = vmatpush1.bf16.msra.mxu0 %v899_v27  ;;  %631 = vmatpush1.bf16.msra.mxu1 %v900_v28 }
  0x39   : > { %511 = vmatprep.subr.bf16.mxu0 %v927_v0  ;;  %632 = vmatprep.subr.bf16.mxu1 %v927_v0 }
  0x3a   : > { %831 = vmatprep.mubr.msk.bf16.mxu0 %vm259_vm0, %v961_v1  ;;  %861 = vmatprep.mubr.msk.bf16.mxu1 %vm259_vm0, %v961_v1 }
  0x3c   : > { %512 = vmatpush1.bf16.msra.mxu0 %v901_v29  ;;  %633 = vmatpush1.bf16.msra.mxu1 %v902_v30 }
  0x3d   : > { %513 = vmatprep.subr.bf16.mxu0 %v927_v0  ;;  %634 = vmatprep.subr.bf16.mxu1 %v927_v0 }
  0x40   : > { %514 = vmatpush1.bf16.msra.mxu0 %v903_v31  ;;  %635 = vmatpush1.bf16.msra.mxu1 %v904_v32 }
  0x41   : > { %515 = vmatprep.subr.bf16.mxu0 %v927_v0  ;;  %636 = vmatprep.subr.bf16.mxu1 %v927_v0 }
  0x44   : > { %516 = vmatpush1.bf16.msra.mxu0 %v905_v33  ;;  %637 = vmatpush1.bf16.msra.mxu1 %v906_v34 }
  0x45   : > { %517 = vmatprep.subr.bf16.mxu0 %v927_v0  ;;  %638 = vmatprep.subr.bf16.mxu1 %v927_v0 }
  0x48   : > { %518 = vmatpush1.bf16.msra.mxu0 %v907_v35  ;;  %639 = vmatpush1.bf16.msra.mxu1 %v908_v36 }
  0x49   : > { %519 = vmatprep.subr.bf16.mxu0 %v927_v0  ;;  %640 = vmatprep.subr.bf16.mxu1 %v927_v0 }
  0x4c   : > { %520 = vmatpush1.bf16.msra.mxu0 %v909_v37  ;;  %641 = vmatpush1.bf16.msra.mxu1 %v910_v38 }
  0x4d   : > { %521 = vmatprep.subr.bf16.mxu0 %v927_v0  ;;  %642 = vmatprep.subr.bf16.mxu1 %v927_v0 }
  0x50   : > { %522 = vmatpush1.bf16.msra.mxu0 %v911_v39  ;;  %643 = vmatpush1.bf16.msra.mxu1 %v912_v40 }
  0x51   : > { %523 = vmatprep.subr.bf16.mxu0 %v927_v0  ;;  %644 = vmatprep.subr.bf16.mxu1 %v927_v0 }
  0x54   : > { %524 = vmatpush1.bf16.msra.mxu0 %v913_v41  ;;  %645 = vmatpush1.bf16.msra.mxu1 %v914_v42 }
  0x55   : > { %537 = vmatprep.subr.bf16.mxu0 %v927_v0  ;;  %658 = vmatprep.subr.bf16.mxu1 %v927_v0 }
  0x58   : > { %538 = vmatpush2.bf16.msra.mxu0 %v507_v45  ;;  %659 = vmatpush2.bf16.msra.mxu1 %v628_v46 }
  0x59   : > { %539 = vmatprep.subr.bf16.mxu0 %v927_v0  ;;  %660 = vmatprep.subr.bf16.mxu1 %v927_v0 }
  0x5c   : > { %540 = vmatpush2.bf16.msra.mxu0 %v917_v47  ;;  %661 = vmatpush2.bf16.msra.mxu1 %v918_v48 }
  0x5f   : > { %542 = vmatmul.mubr.bf16.vlgmr.msra.gmra.mxu0 %v1025_v26  ;;  %663 = vmatmul.mubr.bf16.vlgmr.msra.gmra.mxu1 %v1025_v26 }
  0x89   : > { %v682_v62 = vpop.permute.xlu0 %681 }
  0x8d   : > { %v687_v10 = vpop.permute.xlu0 %686 }
  0xf7   : > { %v301_v49 = vpop.f32.mrf.mxu0  ;;  %v422_v50 = vpop.f32.mrf.mxu1 }
  0xf8   : > { %v671_v59 = vmax.f32 %v301_v49, %v422_v50 }
  0xf9   : > { %v303_v51 = vpop.f32.mrf.mxu0  ;;  %v424_v52 = vpop.f32.mrf.mxu1 }
  0xfb   : > { %v304_v53 = vpop.f32.mrf.mxu0  ;;  %v425_v54 = vpop.f32.mrf.mxu1 }
  0xfc   : > { %v672_v3 = vmax.f32 %v304_v53, %v425_v54 }
  0xfd   : > { %v306_v55 = vpop.f32.mrf.mxu0  ;;  %v427_v56 = vpop.f32.mrf.mxu1 }
 0x11f   : > { %v543_v57 = vpop.f32.mrf.mxu0  ;;  %v664_v58 = vpop.f32.mrf.mxu1 }
 0x120   : > { %v673_v60 = vmax.f32 %v543_v57, %v664_v58 }
 0x121   : > { %v545_v61 = vpop.f32.mrf.mxu0  ;;  %v666_v63 = vpop.f32.mrf.mxu1 }
 0x122   : > { %v675_v0 = vmax.f32 %v671_v59, %v673_v60 }
 0x123   : > { %v546_v1 = vpop.f32.mrf.mxu0  ;;  %v667_v2 = vpop.f32.mrf.mxu1 }
 0x124   : > { %v689_v4 = vadd.f32 %v682_v62, %v675_v0  ;;  %v674_v5 = vmax.f32 %v546_v1, %v667_v2 }
 0x125   : > { %v548_v6 = vpop.f32.mrf.mxu0  ;;  %v669_v7 = vpop.f32.mrf.mxu1 }
 0x126   : > { %v691_v8 = vmax.f32 %v689_v4, 0.0  ;;  %v676_v9 = vmax.f32 %v672_v3, %v674_v5 }
 0x128   : > { %694 = vst.msk [vmem:[%s170_s29] sm:$0xff] %vm693_vm2, %v691_v8  ;;  %v690_v11 = vadd.f32 %v687_v10, %v676_v9 }
 0x12a   : > { %v692_v12 = vmax.f32 %v690_v11, 0.0 }
 0x12c   : > { %695 = vst.msk [vmem:[%s170_s29 + $0x8] sm:$0xff] %vm693_vm2, %v692_v12 }
 0x12d PF: > { %s13_s12 = sadd.s32 1, %s925_s12  }
 0x12e   : > { %p10_p4 = scmp.ge.s32.totalorder %s13_s12, 4  }
 0x130   :  { %12 = sbr.rel (!%p10_p4) target bundleno = 1 (0x1), region = 65 }

// kernel: net_forward.5
= control target key start
LH: loop header
LB: loop body
LE: loop exit
PB: predicated region body
PF: predicated region fallthrough
CT: control target
= control target key end

     0   :  { %v604_v3 = vmov 0.0   ;;  %s969_s0 = inlined_call_operand.vmem [shape: f32[8,400], index: 0, kind: input, shape index: {}]   ;;  %s970_s1 = inlined_call_operand.vmem [shape: f32[400,128], index: 1, kind: input, shape index: {}]   ;;  %s971_s2 = inlined_call_operand.vmem [shape: f32[1,128], index: 2, kind: input, shape index: {}]   ;;  %s972_s3 = inlined_call_operand.vmem [shape: f32[128,128], index: 3, kind: input, shape index: {}]   ;;  %s973_s4 = inlined_call_operand.vmem [shape: f32[1,128], index: 4, kind: input, shape index: {}]   ;;  %s974_s5 = inlined_call_operand.vmem [shape: f32[128,10], index: 5, kind: input, shape index: {}]   ;;  %s975_s6 = inlined_call_operand.vmem [shape: f32[1,10], index: 6, kind: input, shape index: {}]   ;;  %s976_s7 = inlined_call_operand.hbm [shape: f32[8,10], index: 7, kind: output, shape index: {}]  }
   0x1   :  { %v62_v0 = vld [vmem:[%s970_s1 + $0xf8] sm:$0xff]  ;;  %162 = vmatprep.subr.mxu1 %v604_v3  ;;  %v61_v4 = vld [vmem:[%s970_s1 + $0xf0] sm:$0xff]  ;;  %v60_v7 = vld [vmem:[%s970_s1 + $0xe8] sm:$0xff] }
   0x2   :  { %v46_v1 = vld [vmem:[%s970_s1 + $0x78] sm:$0xff]  ;;  %440 = vmatprep.subr.mxu0 %v62_v0  ;;  %v45_v5 = vld [vmem:[%s970_s1 + $0x70] sm:$0xff]  ;;  %v44_v8 = vld [vmem:[%s970_s1 + $0x68] sm:$0xff] }
   0x3   :  { %v78_v2 = vld [vmem:[%s970_s1 + $0x178] sm:$0xff]  ;;  %v77_v6 = vld [vmem:[%s970_s1 + $0x170] sm:$0xff]  ;;  %441 = vmatpush3.msra.mxu0 %v46_v1  ;;  %v76_v9 = vld [vmem:[%s970_s1 + $0x168] sm:$0xff] }
   0x4   :  { %163 = vmatpush1.msra.mxu1 %v78_v2  ;;  %442 = vmatprep.subr.mxu0 %v61_v4  ;;  %v59_v10 = vld [vmem:[%s970_s1 + $0xe0] sm:$0xff]  ;;  %v58_v13 = vld [vmem:[%s970_s1 + $0xd8] sm:$0xff]  ;;  %v57_v16 = vld [vmem:[%s970_s1 + $0xd0] sm:$0xff] }
   0x5   :  { %164 = vmatprep.subr.mxu1 %v604_v3  ;;  %443 = vmatpush3.msra.mxu0 %v45_v5  ;;  %v43_v11 = vld [vmem:[%s970_s1 + $0x60] sm:$0xff]  ;;  %v42_v14 = vld [vmem:[%s970_s1 + $0x58] sm:$0xff]  ;;  %v41_v17 = vld [vmem:[%s970_s1 + $0x50] sm:$0xff] }
   0x6   :  { %165 = vmatpush1.msra.mxu1 %v77_v6  ;;  %444 = vmatprep.subr.mxu0 %v60_v7  ;;  %v75_v12 = vld [vmem:[%s970_s1 + $0x160] sm:$0xff]  ;;  %v74_v15 = vld [vmem:[%s970_s1 + $0x158] sm:$0xff]  ;;  %v73_v18 = vld [vmem:[%s970_s1 + $0x150] sm:$0xff] }
   0x7   :  { %166 = vmatprep.subr.mxu1 %v604_v3  ;;  %445 = vmatpush3.msra.mxu0 %v44_v8  ;;  %v56_v19 = vld [vmem:[%s970_s1 + $0xc8] sm:$0xff]  ;;  %v55_v22 = vld [vmem:[%s970_s1 + $0xc0] sm:$0xff]  ;;  %v54_v25 = vld [vmem:[%s970_s1 + $0xb8] sm:$0xff] }
   0x8   :  { %167 = vmatpush1.msra.mxu1 %v76_v9  ;;  %446 = vmatprep.subr.mxu0 %v59_v10  ;;  %v40_v20 = vld [vmem:[%s970_s1 + $0x48] sm:$0xff]  ;;  %v39_v23 = vld [vmem:[%s970_s1 + $0x40] sm:$0xff]  ;;  %v38_v26 = vld [vmem:[%s970_s1 + $0x38] sm:$0xff] }
   0x9   :  { %168 = vmatprep.subr.mxu1 %v604_v3  ;;  %447 = vmatpush3.msra.mxu0 %v43_v11  ;;  %v72_v21 = vld [vmem:[%s970_s1 + $0x148] sm:$0xff]  ;;  %v71_v24 = vld [vmem:[%s970_s1 + $0x140] sm:$0xff]  ;;  %v70_v27 = vld [vmem:[%s970_s1 + $0x138] sm:$0xff] }
   0xa   :  { %169 = vmatpush1.msra.mxu1 %v75_v12  ;;  %448 = vmatprep.subr.mxu0 %v58_v13  ;;  %v53_v28 = vld [vmem:[%s970_s1 + $0xb0] sm:$0xff]  ;;  %v52_v31 = vld [vmem:[%s970_s1 + $0xa8] sm:$0xff]  ;;  %v51_v34 = vld [vmem:[%s970_s1 + $0xa0] sm:$0xff] }
   0xb   :  { %170 = vmatprep.subr.mxu1 %v604_v3  ;;  %449 = vmatpush3.msra.mxu0 %v42_v14  ;;  %v37_v29 = vld [vmem:[%s970_s1 + $0x30] sm:$0xff]  ;;  %v36_v32 = vld [vmem:[%s970_s1 + $0x28] sm:$0xff]  ;;  %v35_v35 = vld [vmem:[%s970_s1 + $0x20] sm:$0xff] }
   0xc   :  { %171 = vmatpush1.msra.mxu1 %v74_v15  ;;  %450 = vmatprep.subr.mxu0 %v57_v16  ;;  %v69_v30 = vld [vmem:[%s970_s1 + $0x130] sm:$0xff]  ;;  %v68_v33 = vld [vmem:[%s970_s1 + $0x128] sm:$0xff]  ;;  %v67_v36 = vld [vmem:[%s970_s1 + $0x120] sm:$0xff] }
   0xd   :  { %172 = vmatprep.subr.mxu1 %v604_v3  ;;  %451 = vmatpush3.msra.mxu0 %v41_v17 }
   0xe   :  { %173 = vmatpush1.msra.mxu1 %v73_v18  ;;  %452 = vmatprep.subr.mxu0 %v56_v19 }
   0xf   :  { %174 = vmatprep.subr.mxu1 %v604_v3  ;;  %453 = vmatpush3.msra.mxu0 %v40_v20 }
  0x10   :  { %175 = vmatpush1.msra.mxu1 %v72_v21  ;;  %454 = vmatprep.subr.mxu0 %v55_v22 }
  0x11   :  { %176 = vmatprep.subr.mxu1 %v604_v3  ;;  %455 = vmatpush3.msra.mxu0 %v39_v23 }
  0x12   :  { %177 = vmatpush1.msra.mxu1 %v71_v24  ;;  %456 = vmatprep.subr.mxu0 %v54_v25 }
  0x13   :  { %178 = vmatprep.subr.mxu1 %v604_v3  ;;  %457 = vmatpush3.msra.mxu0 %v38_v26 }
  0x14   :  { %179 = vmatpush1.msra.mxu1 %v70_v27  ;;  %458 = vmatprep.subr.mxu0 %v53_v28 }
  0x15   :  { %180 = vmatprep.subr.mxu1 %v604_v3  ;;  %459 = vmatpush3.msra.mxu0 %v37_v29 }
  0x16   :  { %181 = vmatpush1.msra.mxu1 %v69_v30  ;;  %460 = vmatprep.subr.mxu0 %v52_v31 }
  0x17   :  { %182 = vmatprep.subr.mxu1 %v604_v3 }
  0x18   :  { %12 = vsyncpa [#allocation3], 0  ;;  %461 = vmatpush3.msra.mxu0 %v36_v32  ;;  %183 = vmatpush1.msra.mxu1 %v68_v33  ;;  %v50_v37 = vld [vmem:[%s970_s1 + $0x98] sm:$0xff]  ;;  %v49_v40 = vld [vmem:[%s970_s1 + $0x90] sm:$0xff]  ;;  %vm88_vm0 = vcmask 130048   ;;  %vm605_vm1 = vmmov 0  }
  0x19   :  { %462 = vmatprep.subr.mxu0 %v51_v34  ;;  %184 = vmatprep.subr.mxu1 %v604_v3  ;;  %v34_v38 = vld [vmem:[%s970_s1 + $0x18] sm:$0xff]  ;;  %v33_v41 = vld [vmem:[%s970_s1 + $0x10] sm:$0xff]  ;;  %v48_v43 = vld [vmem:[%s970_s1 + $0x88] sm:$0xff]  ;;  %s606_s9 = smov [#allocation2]   ;;  %vm420_vm2 = vcmask 80896  }
  0x1a   :  { %v66_v39 = vld [vmem:[%s970_s1 + $0x118] sm:$0xff]  ;;  %463 = vmatpush3.msra.mxu0 %v35_v35  ;;  %185 = vmatpush1.msra.mxu1 %v67_v36  ;;  %v65_v42 = vld [vmem:[%s970_s1 + $0x110] sm:$0xff]  ;;  %v32_v44 = vld [vmem:[%s970_s1 + $0x8] sm:$0xff]  ;;  %s428_s10 = sshll.u32 %s606_s9, 4  ;;  %s429_s10 = int_to_ptr.vmem [resolvable:$true] %s428_s10 }
  0x1b   :  { %464 = vmatprep.subr.mxu0 %v50_v37  ;;  %186 = vmatprep.subr.mxu1 %v604_v3  ;;  %v64_v45 = vld [vmem:[%s970_s1 + $0x108] sm:$0xff]  ;;  %v47_v46 = vld [vmem:[%s970_s1 + $0x80] sm:$0xff]  ;;  %v30_v51 = vld [vmem:[%s969_s0 + $0x18] sm:$0xff]  ;;  %p587_p1 = scmp.lt.s32.totalorder %s429_s10, %s429_s10 }
  0x1c   :  { %465 = vmatpush3.msra.mxu0 %v34_v38  ;;  %187 = vmatpush1.msra.mxu1 %v66_v39  ;;  %v31_v47 = vld [vmem:[%s970_s1] sm:$0xff]  ;;  %v28_v48 = vld [vmem:[%s969_s0 + $0x8] sm:$0xff]  ;;  %v248_v53 = vld [vmem:[%s972_s3 + $0x78] sm:$0xff] }
  0x1d   :  { %466 = vmatprep.subr.mxu0 %v49_v40  ;;  %188 = vmatprep.subr.mxu1 %v604_v3  ;;  %v63_v49 = vld [vmem:[%s970_s1 + $0x100] sm:$0xff]  ;;  %v80_v52 = vld [vmem:[%s970_s1 + $0x188] sm:$0xff]  ;;  %v29_v55 = vld [vmem:[%s969_s0 + $0x10] sm:$0xff] }
  0x1e   :  { %467 = vmatpush3.msra.mxu0 %v33_v41  ;;  %189 = vmatpush1.msra.mxu1 %v65_v42  ;;  %v27_v50 = vld [vmem:[%s969_s0] sm:$0xff]  ;;  %v247_v56 = vld [vmem:[%s972_s3 + $0x70] sm:$0xff]  ;;  %v246_v57 = vld [vmem:[%s972_s3 + $0x68] sm:$0xff] }
  0x1f   :  { %468 = vmatprep.subr.mxu0 %v48_v43  ;;  %190 = vmatprep.subr.mxu1 %v604_v3  ;;  %v79_v54 = vld [vmem:[%s970_s1 + $0x180] sm:$0xff]  ;;  %v244_v59 = vld [vmem:[%s972_s3 + $0x58] sm:$0xff]  ;;  %v243_v60 = vld [vmem:[%s972_s3 + $0x50] sm:$0xff] }
  0x20   :  { %469 = vmatpush3.msra.mxu0 %v32_v44  ;;  %191 = vmatpush1.msra.mxu1 %v64_v45  ;;  %v245_v58 = vld [vmem:[%s972_s3 + $0x60] sm:$0xff]  ;;  %v242_v61 = vld [vmem:[%s972_s3 + $0x48] sm:$0xff]  ;;  %v240_v63 = vld [vmem:[%s972_s3 + $0x38] sm:$0xff] }
  0x21   :  { %470 = vmatprep.subr.mxu0 %v47_v46  ;;  %192 = vmatprep.subr.mxu1 %v604_v3  ;;  %v241_v62 = vld [vmem:[%s972_s3 + $0x40] sm:$0xff]  ;;  %v239_v0 = vld [vmem:[%s972_s3 + $0x30] sm:$0xff]  ;;  %v238_v1 = vld [vmem:[%s972_s3 + $0x28] sm:$0xff] }
  0x22   :  { %471 = vmatpush3.msra.mxu0 %v31_v47  ;;  %156 = vmatprep.mubr.f32.mxu0 %v28_v48  ;;  %v237_v2 = vld [vmem:[%s972_s3 + $0x20] sm:$0xff]  ;;  %v236_v4 = vld [vmem:[%s972_s3 + $0x18] sm:$0xff]  ;;  %v235_v5 = vld [vmem:[%s972_s3 + $0x10] sm:$0xff] }
  0x23   :  { %193 = vmatpush1.msra.mxu1 %v63_v49  ;;  %157 = vmatmul.mubr.f32.vlgmr.msra.gmra.mxu0 %v27_v50  ;;  %v234_v6 = vld [vmem:[%s972_s3 + $0x8] sm:$0xff]  ;;  %v233_v7 = vld [vmem:[%s972_s3] sm:$0xff]  ;;  %v342_v8 = vld [vmem:[%s974_s5 + $0x78] sm:$0xff] }
  0x24   :  { %222 = vmatprep.subr.mxu1 %v604_v3  ;;  %437 = vmatprep.mubr.msk.f32.mxu1 %vm88_vm0, %v30_v51  ;;  %v341_v9 = vld [vmem:[%s974_s5 + $0x70] sm:$0xff]  ;;  %v340_v10 = vld [vmem:[%s974_s5 + $0x68] sm:$0xff]  ;;  %v339_v11 = vld [vmem:[%s974_s5 + $0x60] sm:$0xff] }
  0x25   :  { %223 = vmatpush2.msra.mxu1 %v80_v52  ;;  %509 = vmatprep.subr.mxu0 %v604_v3  ;;  %v338_v12 = vld [vmem:[%s974_s5 + $0x58] sm:$0xff]  ;;  %v337_v13 = vld [vmem:[%s974_s5 + $0x50] sm:$0xff]  ;;  %v336_v14 = vld [vmem:[%s974_s5 + $0x48] sm:$0xff] }
  0x26   :  { %224 = vmatprep.subr.mxu1 %v604_v3  ;;  %510 = vmatpush3.msra.mxu0 %v248_v53  ;;  %v335_v15 = vld [vmem:[%s974_s5 + $0x40] sm:$0xff]  ;;  %v334_v16 = vld [vmem:[%s974_s5 + $0x38] sm:$0xff]  ;;  %v333_v17 = vld [vmem:[%s974_s5 + $0x30] sm:$0xff] }
  0x27   :  { %225 = vmatpush2.msra.mxu1 %v79_v54  ;;  %511 = vmatprep.subr.mxu0 %v604_v3  ;;  %v332_v18 = vld [vmem:[%s974_s5 + $0x28] sm:$0xff]  ;;  %v331_v19 = vld [vmem:[%s974_s5 + $0x20] sm:$0xff]  ;;  %v330_v20 = vld [vmem:[%s974_s5 + $0x18] sm:$0xff] }
  0x28   :  { %227 = vmatmul.mubr.f32.vlgmr.msra.gmra.mxu1 %v29_v55  ;;  %512 = vmatpush3.msra.mxu0 %v247_v56  ;;  %v436_v23 = vld [vmem:[%s971_s2] ss:$0 sm:$0xff]  ;;  %v329_v30 = vld [vmem:[%s974_s5 + $0x10] sm:$0xff]  ;;  %v328_v31 = vld [vmem:[%s974_s5 + $0x8] sm:$0xff] }
  0x29   :  { %513 = vmatprep.subr.mxu0 %v604_v3  ;;  %544 = vmatprep.subr.mxu1 %v604_v3  ;;  %v327_v32 = vld [vmem:[%s974_s5] sm:$0xff]  ;;  %s582_s5 = scalar_lea.vmem %s429_s10, 128 }
  0x2a   :  { %514 = vmatpush3.msra.mxu0 %v246_v57  ;;  %541 = vmatprep.mubr.msk.f32.mxu0 %vm605_vm1, %v604_v3  ;;  %v438_v33 = vld [vmem:[%s973_s4] ss:$0 sm:$0xff]  ;;  %p583_p0 = scmp.ne.s32.totalorder %s429_s10, %s582_s5  ;;  %p588_p2 = scmp.lt.s32.totalorder %s582_s5, %s582_s5 }
  0x2b   :  { %515 = vmatprep.subr.mxu0 %v604_v3  ;;  %576 = vmatprep.mubr.msk.f32.mxu1 %vm605_vm1, %v604_v3  ;;  %v439_v38 = vld [vmem:[%s975_s6] ss:$0 sm:$0xff] }
  0x2c   :  { %516 = vmatpush3.msra.mxu0 %v245_v58  ;;  %545 = vmatpush3.msra.mxu1 %v342_v8  ;;  %p589_p3 = por %p588_p2, %p587_p1 }
  0x2d   :  { %517 = vmatprep.subr.mxu0 %v604_v3  ;;  %546 = vmatprep.subr.mxu1 %v604_v3 }
  0x2e   :  { %518 = vmatpush3.msra.mxu0 %v244_v59  ;;  %547 = vmatpush3.msra.mxu1 %v341_v9  ;;  %p590_p4 = pnand %p589_p3, %p583_p0 }
  0x2f   :  { %519 = vmatprep.subr.mxu0 %v604_v3  ;;  %548 = vmatprep.subr.mxu1 %v604_v3 }
  0x30   :  { %520 = vmatpush3.msra.mxu0 %v243_v60  ;;  %549 = vmatpush3.msra.mxu1 %v340_v10 }
  0x31   :  { %521 = vmatprep.subr.mxu0 %v604_v3  ;;  %550 = vmatprep.subr.mxu1 %v604_v3 }
  0x32   :  { %522 = vmatpush3.msra.mxu0 %v242_v61  ;;  %551 = vmatpush3.msra.mxu1 %v339_v11 }
  0x33   :  { %523 = vmatprep.subr.mxu0 %v604_v3  ;;  %552 = vmatprep.subr.mxu1 %v604_v3 }
  0x34   :  { %524 = vmatpush3.msra.mxu0 %v241_v62  ;;  %553 = vmatpush3.msra.mxu1 %v338_v12 }
  0x35   :  { %525 = vmatprep.subr.mxu0 %v604_v3  ;;  %554 = vmatprep.subr.mxu1 %v604_v3 }
  0x36   :  { %526 = vmatpush3.msra.mxu0 %v240_v63  ;;  %555 = vmatpush3.msra.mxu1 %v337_v13 }
  0x37   :  { %527 = vmatprep.subr.mxu0 %v604_v3  ;;  %556 = vmatprep.subr.mxu1 %v604_v3 }
  0x38   :  { %528 = vmatpush3.msra.mxu0 %v239_v0  ;;  %557 = vmatpush3.msra.mxu1 %v336_v14 }
  0x39   :  { %529 = vmatprep.subr.mxu0 %v604_v3  ;;  %558 = vmatprep.subr.mxu1 %v604_v3 }
  0x3a   :  { %530 = vmatpush3.msra.mxu0 %v238_v1  ;;  %559 = vmatpush3.msra.mxu1 %v335_v15 }
  0x3b   :  { %531 = vmatprep.subr.mxu0 %v604_v3  ;;  %560 = vmatprep.subr.mxu1 %v604_v3 }
  0x3c   :  { %532 = vmatpush3.msra.mxu0 %v237_v2  ;;  %561 = vmatpush3.msra.mxu1 %v334_v16 }
  0x3d   :  { %533 = vmatprep.subr.mxu0 %v604_v3  ;;  %562 = vmatprep.subr.mxu1 %v604_v3 }
  0x3e   :  { %534 = vmatpush3.msra.mxu0 %v236_v4  ;;  %563 = vmatpush3.msra.mxu1 %v333_v17 }
  0x3f   :  { %535 = vmatprep.subr.mxu0 %v604_v3  ;;  %564 = vmatprep.subr.mxu1 %v604_v3 }
  0x40   :  { %536 = vmatpush3.msra.mxu0 %v235_v5  ;;  %565 = vmatpush3.msra.mxu1 %v332_v18 }
  0x41   :  { %537 = vmatprep.subr.mxu0 %v604_v3  ;;  %566 = vmatprep.subr.mxu1 %v604_v3 }
  0x42   :  { %538 = vmatpush3.msra.mxu0 %v234_v6  ;;  %567 = vmatpush3.msra.mxu1 %v331_v19 }
  0x43   :  { %539 = vmatprep.subr.mxu0 %v604_v3  ;;  %568 = vmatprep.subr.mxu1 %v604_v3 }
  0x44   :  { %540 = vmatpush3.msra.mxu0 %v233_v7  ;;  %569 = vmatpush3.msra.mxu1 %v330_v20 }
  0x45   :  { %570 = vmatprep.subr.mxu1 %v604_v3 }
  0x46   :  { %571 = vmatpush3.msra.mxu1 %v329_v30 }
  0x47   :  { %572 = vmatprep.subr.mxu1 %v604_v3 }
  0x48   :  { %573 = vmatpush3.msra.mxu1 %v328_v31 }
  0x49   :  { %574 = vmatprep.subr.mxu1 %v604_v3 }
  0x4a   :  { %575 = vmatpush3.msra.mxu1 %v327_v32 }
  0xe3   :  { %v472_v21 = vpop.f32.mrf.mxu0 }
  0xe5   :  { %v473_v22 = vpop.f32.mrf.mxu0 }
  0xe6   :  { %v474_v24 = vadd.f32 %v473_v22, %v472_v21 }
  0xe8   :  { %v159_v25 = vadd.f32 %v474_v24, %v436_v23  ;;  %v228_v26 = vpop.f32.mrf.mxu1 }
  0xea   :  { %v229_v27 = vadd.f32 %v228_v26, %v159_v25  ;;  %v230_v28 = vpop.f32.mrf.mxu1 }
  0xec   :  { %v232_v29 = vmax.f32 %v229_v27, 0.0 }
  0xee   :  { %542 = vmatmul.mubr.f32.vlgmr.msra.gmra.mxu0 %v232_v29 }
 0x1ae   :  { %v322_v34 = vpop.f32.mrf.mxu0 }
 0x1af   :  { %v323_v35 = vadd.f32 %v438_v33, %v322_v34 }
 0x1b0   :  { %v543_v36 = vpop.f32.mrf.mxu0 }
 0x1b1   :  { %v326_v37 = vmax.f32 %v323_v35, 0.0 }
 0x1b3   :  { %577 = vmatmul.mubr.f32.vlgmr.msra.gmra.mxu1 %v326_v37 }
 0x273   :  { %v416_v39 = vpop.f32.mrf.mxu1 }
 0x274   :  { %v417_v40 = vadd.f32 %v439_v38, %v416_v39 }
 0x275   :  { %v578_v3 = vpop.f32.mrf.mxu1 }
 0x276   :  { %421 = vst.msk [vmem:[#allocation2] sm:$0xff] %vm420_vm2, %v417_v40 }
 0x277   :  { %593 = shalt.err (!%p590_p4)
}
 0x278   :  { %431 = dma.vmem_to_hbm [thread:$0]  %s429_s10, 128, %s976_s7, [#allocation3]  }
 0x279   :  { %602 = dma.done.wait [#allocation3], 128  }
 0x27a   :  { %603 = vsyncadd [#allocation3], 4294967168 }
 0x27b   :  { %435 = vsyncpa [#allocation3], 1 }

</bundles_post_ra>
